<compile_context>
chip_gen: v7x
topology: tpu7x:2x2x1
jax: 0.10.0
libtpu: 0.0.40
codegen_flags: <defaults>
</compile_context>

<pallas_src>
import jax
import jax.numpy as jnp
from jax.experimental import pallas as pl
from jax.experimental.pallas import tpu as pltpu


# ----------------------------- Pallas kernels ------------------------------

def _conv_relu_pool_kernel(a0_ref, a1_ref, a2_ref, a3_ref, wt_ref, b_ref, o_ref):
    """Fused conv(matmul) + bias + ReLU + 2x2 max-pool.

    a*_ref : (K, tm) bf16 im2col columns for the 4 pooling phases
    wt_ref : (O, K)  bf16 weights (K ordered (kh, kw, c))
    b_ref  : (O, 1)  f32  bias
    o_ref  : (O, tm) bf16 pooled output (lane-dense along output positions)
    """
    w = wt_ref[...]

    def mm(a_ref):
        return jnp.dot(w, a_ref[...], preferred_element_type=jnp.float32)

    m = jnp.maximum(jnp.maximum(mm(a0_ref), mm(a1_ref)),
                    jnp.maximum(mm(a2_ref), mm(a3_ref)))
    # bias is phase-invariant and ReLU is monotone, so pool(relu(x+b)) ==
    # relu(max_phases(x) + b).
    m = jnp.maximum(m + b_ref[...], 0.0)
    o_ref[...] = m.astype(o_ref.dtype)


def _fc_head_kernel(x_ref, w1_ref, b1_ref, w2_ref, b2_ref, w3_ref, b3_ref,
                    o_ref):
    """Fused fc1+ReLU -> fc2+ReLU -> fc3+softmax (dim=1), all in VMEM."""
    h = jnp.dot(x_ref[...], w1_ref[...],
                preferred_element_type=jnp.float32) + b1_ref[...]
    h = jnp.maximum(h, 0.0).astype(jnp.bfloat16)
    h = jnp.dot(h, w2_ref[...],
                preferred_element_type=jnp.float32) + b2_ref[...]
    h = jnp.maximum(h, 0.0).astype(jnp.bfloat16)
    z = jnp.dot(h, w3_ref[...],
                preferred_element_type=jnp.float32) + b3_ref[...]
    # stable softmax over the class dim (F.softmax default dim=1 for 2D)
    z = z - jnp.max(z, axis=-1, keepdims=True)
    e = jnp.exp(z)
    inv = pl.reciprocal(jnp.sum(e, axis=-1, keepdims=True), approx=True)
    o_ref[...] = (e * inv).astype(o_ref.dtype)


# ------------------------------ wrappers ------------------------------------

_VMEM_LIMIT = 32 * 1024 * 1024  # explicit scoped-VMEM budget (safe on v5e..v7x)


def conv_relu_pool(x_nhwc, wt, b, kh=5, kw=5):
    """x: (N, H, W, C); wt: (O, kh*kw*C) bf16; b: (O, 1) f32.

    Returns pooled activations (N, PH, PW, O) in bf16 (valid conv, stride 1,
    then 2x2/2 max pool), matching relu->pool of the PyTorch module.
    """
    N, H, W, C = x_nhwc.shape
    O, K = wt.shape
    assert K == kh * kw * C
    OH, OW = H - kh + 1, W - kw + 1
    PH, PW = OH // 2, OW // 2
    M = N * PH * PW

    # Build the 4 phase im2col matrices (K, M) as strided views of the small
    # input -- pure XLA glue fused under jit; no full-res im2col in HBM.
    phases = []
    for p in (0, 1):
        for q in (0, 1):
            cols = [x_nhwc[:, p + i: p + i + 2 * PH: 2,
                           q + j: q + j + 2 * PW: 2, :]
                    for i in range(kh) for j in range(kw)]       # (N,PH,PW,C)
            a = jnp.stack(cols, axis=0)                          # (kh*kw,N,PH,PW,C)
            a = jnp.transpose(a, (0, 4, 1, 2, 3))                # (kh*kw,C,N,PH,PW)
            phases.append(a.reshape(K, M).astype(jnp.bfloat16))

    tm = 256 if M >= 256 else M
    grid = (pl.cdiv(M, tm),)
    a_spec = pl.BlockSpec((K, tm), lambda i: (0, i))

    out = pl.pallas_call(
        _conv_relu_pool_kernel,
        out_shape=jax.ShapeDtypeStruct((O, M), jnp.bfloat16),
        grid=grid,
        in_specs=[a_spec, a_spec, a_spec, a_spec,
                  pl.BlockSpec((O, K), lambda i: (0, 0)),
                  pl.BlockSpec((O, 1), lambda i: (0, 0))],
        out_specs=pl.BlockSpec((O, tm), lambda i: (0, i)),
        compiler_params=pltpu.CompilerParams(
            dimension_semantics=("parallel",),
            vmem_limit_bytes=_VMEM_LIMIT),
    )(phases[0], phases[1], phases[2], phases[3], wt, b)

    # (O, M) -> (N, PH, PW, O)   (layout plumbing, fused under jit)
    return jnp.transpose(out.reshape(O, N, PH, PW), (1, 2, 3, 0))


def fc_head(x, w1, b1, w2, b2, w3, b3):
    """x: (B, 400) bf16 -> softmax probs (B, 10) f32, one fused kernel."""
    B, K = x.shape
    n_cls = w3.shape[1]
    tb = 256 if B >= 256 else B
    grid = (pl.cdiv(B, tb),)

    def full(shape):
        return pl.BlockSpec(shape, lambda i: (0, 0))

    return pl.pallas_call(
        _fc_head_kernel,
        out_shape=jax.ShapeDtypeStruct((B, n_cls), jnp.float32),
        grid=grid,
        in_specs=[pl.BlockSpec((tb, K), lambda i: (i, 0)),
                  full(w1.shape), full(b1.shape),
                  full(w2.shape), full(b2.shape),
                  full(w3.shape), full(b3.shape)],
        out_specs=pl.BlockSpec((tb, n_cls), lambda i: (i, 0)),
        compiler_params=pltpu.CompilerParams(
            dimension_semantics=("parallel",),
            vmem_limit_bytes=_VMEM_LIMIT),
    )(x.astype(jnp.bfloat16), w1, b1, w2, b2, w3, b3)


# ------------------------------ ConvNet -------------------------------------

def init_params(key):
    """Deterministic PyTorch-style (uniform +/- 1/sqrt(fan_in)) init,
    in PyTorch layouts: conv (O, C, KH, KW); linear (out, in)."""
    def uniform(k, shape, fan_in):
        bound = 1.0 / jnp.sqrt(jnp.float32(fan_in))
        return jax.random.uniform(k, shape, jnp.float32, -bound, bound)

    ks = jax.random.split(key, 10)
    return {
        "conv1_w": uniform(ks[0], (6, 3, 5, 5), 3 * 5 * 5),
        "conv1_b": uniform(ks[1], (6,), 3 * 5 * 5),
        "conv2_w": uniform(ks[2], (16, 6, 5, 5), 6 * 5 * 5),
        "conv2_b": uniform(ks[3], (16,), 6 * 5 * 5),
        "fc1_w": uniform(ks[4], (120, 400), 400),
        "fc1_b": uniform(ks[5], (120,), 400),
        "fc2_w": uniform(ks[6], (84, 120), 120),
        "fc2_b": uniform(ks[7], (84,), 120),
        "fc3_w": uniform(ks[8], (10, 84), 84),
        "fc3_b": uniform(ks[9], (10,), 84),
    }


def prepare_params(params):
    """One-time re-layout: conv weights -> (O, KH*KW*C) bf16 matrices, fc
    weights pre-transposed to (in, out) bf16, biases f32 in broadcast shape."""
    def conv_wt(w):
        O, C, KH, KW = w.shape
        return jnp.transpose(w, (0, 2, 3, 1)).reshape(O, KH * KW * C).astype(
            jnp.bfloat16)

    return {
        "c1_wt": conv_wt(params["conv1_w"]),
        "c1_b": params["conv1_b"].reshape(-1, 1).astype(jnp.float32),
        "c2_wt": conv_wt(params["conv2_w"]),
        "c2_b": params["conv2_b"].reshape(-1, 1).astype(jnp.float32),
        "fc1_wt": params["fc1_w"].T.astype(jnp.bfloat16),
        "fc1_b": params["fc1_b"].reshape(1, -1).astype(jnp.float32),
        "fc2_wt": params["fc2_w"].T.astype(jnp.bfloat16),
        "fc2_b": params["fc2_b"].reshape(1, -1).astype(jnp.float32),
        "fc3_wt": params["fc3_w"].T.astype(jnp.bfloat16),
        "fc3_b": params["fc3_b"].reshape(1, -1).astype(jnp.float32),
    }


@jax.jit
def convnet_forward(x_nchw, p):
    # NCHW -> NHWC once; all inter-layer activations stay bf16/NHWC.
    x = jnp.transpose(x_nchw, (0, 2, 3, 1))
    x = conv_relu_pool(x, p["c1_wt"], p["c1_b"])          # (N, 14, 14, 6)
    x = conv_relu_pool(x, p["c2_wt"], p["c2_b"])          # (N, 5, 5, 16)
    # torch .view(-1, 16*5*5) flattens NCHW (c, h, w) order:
    n = x.shape[0]
    x = jnp.transpose(x, (0, 3, 1, 2)).reshape(n, 16 * 5 * 5)
    return fc_head(x, p["fc1_wt"], p["fc1_b"], p["fc2_wt"], p["fc2_b"],
                   p["fc3_wt"], p["fc3_b"])


if __name__ == "__main__":
    key = jax.random.PRNGKey(0)
    pkey, xkey = jax.random.split(key)
    params = prepare_params(init_params(pkey))
    # 32x32 spatial input is implied by the 16*5*5 flatten (CIFAR-sized).
    x = jax.random.normal(xkey, (2, 3, 32, 32), dtype=jnp.float32)

    out = convnet_forward(x, params)
    out = jax.block_until_ready(out)

    assert out.shape == (2, 10), out.shape
    assert bool(jnp.all(jnp.isfinite(out)))
    # softmax rows sum to ~1 (tolerance covers bf16 matmuls + approx recip)
    assert bool(jnp.allclose(jnp.sum(out, axis=-1), 1.0, atol=1e-2))
    print("KERNEL_OK")
</pallas_src>

<mosaic_0001>
module attributes {stable_mosaic.version = 11 : i64} {
  func.func @_conv_relu_pool_kernel(%arg0: i32, %arg1: memref<75x256xbf16, #tpu.memory_space<vmem>>, %arg2: memref<75x256xbf16, #tpu.memory_space<vmem>>, %arg3: memref<75x256xbf16, #tpu.memory_space<vmem>>, %arg4: memref<75x256xbf16, #tpu.memory_space<vmem>>, %arg5: memref<6x75xbf16, #tpu.memory_space<vmem>>, %arg6: memref<6x1xf32, #tpu.memory_space<vmem>>, %arg7: memref<6x256xbf16, #tpu.memory_space<vmem>>) attributes {dimension_semantics = [#tpu.dimension_semantics<parallel>], iteration_bounds = array<i64: 2>, scalar_prefetch = 0 : i64, scratch_operands = 0 : i64, tpu.core_type = #tpu.core_type<tc>, window_params = [{transform_indices = @transform_0, window_bounds = array<i64: 75, 256>}, {transform_indices = @transform_1, window_bounds = array<i64: 75, 256>}, {transform_indices = @transform_2, window_bounds = array<i64: 75, 256>}, {transform_indices = @transform_3, window_bounds = array<i64: 75, 256>}, {pipeline_mode = #tpu.pipeline_mode<synchronous>, transform_indices = @transform_4, window_bounds = array<i64: 6, 75>}, {pipeline_mode = #tpu.pipeline_mode<synchronous>, transform_indices = @transform_5, window_bounds = array<i64: 6, 1>}, {transform_indices = @transform_6, window_bounds = array<i64: 6, 256>}]} {
    %c0 = arith.constant 0 : index
    %c0_0 = arith.constant 0 : index
    %0 = vector.load %arg5[%c0, %c0_0] : memref<6x75xbf16, #tpu.memory_space<vmem>>, vector<6x75xbf16>
    %c0_1 = arith.constant 0 : index
    %c0_2 = arith.constant 0 : index
    %1 = vector.load %arg1[%c0_1, %c0_2] : memref<75x256xbf16, #tpu.memory_space<vmem>>, vector<75x256xbf16>
    %cst = arith.constant dense<0.000000e+00> : vector<6x256xf32>
    %2 = tpu.matmul %0, %1, %cst {dimension_numbers = #tpu.dot_dimension_numbers<[1], [0], [0], [1], [0, 0, 1, 1], [], []>} : vector<6x75xbf16>, vector<75x256xbf16>, vector<6x256xf32> -> vector<6x256xf32>
    %c0_3 = arith.constant 0 : index
    %c0_4 = arith.constant 0 : index
    %3 = vector.load %arg2[%c0_3, %c0_4] : memref<75x256xbf16, #tpu.memory_space<vmem>>, vector<75x256xbf16>
    %cst_5 = arith.constant dense<0.000000e+00> : vector<6x256xf32>
    %4 = tpu.matmul %0, %3, %cst_5 {dimension_numbers = #tpu.dot_dimension_numbers<[1], [0], [0], [1], [0, 0, 1, 1], [], []>} : vector<6x75xbf16>, vector<75x256xbf16>, vector<6x256xf32> -> vector<6x256xf32>
    %5 = arith.maximumf %2, %4 : vector<6x256xf32>
    %c0_6 = arith.constant 0 : index
    %c0_7 = arith.constant 0 : index
    %6 = vector.load %arg3[%c0_6, %c0_7] : memref<75x256xbf16, #tpu.memory_space<vmem>>, vector<75x256xbf16>
    %cst_8 = arith.constant dense<0.000000e+00> : vector<6x256xf32>
    %7 = tpu.matmul %0, %6, %cst_8 {dimension_numbers = #tpu.dot_dimension_numbers<[1], [0], [0], [1], [0, 0, 1, 1], [], []>} : vector<6x75xbf16>, vector<75x256xbf16>, vector<6x256xf32> -> vector<6x256xf32>
    %c0_9 = arith.constant 0 : index
    %c0_10 = arith.constant 0 : index
    %8 = vector.load %arg4[%c0_9, %c0_10] : memref<75x256xbf16, #tpu.memory_space<vmem>>, vector<75x256xbf16>
    %cst_11 = arith.constant dense<0.000000e+00> : vector<6x256xf32>
    %9 = tpu.matmul %0, %8, %cst_11 {dimension_numbers = #tpu.dot_dimension_numbers<[1], [0], [0], [1], [0, 0, 1, 1], [], []>} : vector<6x75xbf16>, vector<75x256xbf16>, vector<6x256xf32> -> vector<6x256xf32>
    %10 = arith.maximumf %7, %9 : vector<6x256xf32>
    %11 = arith.maximumf %5, %10 : vector<6x256xf32>
    %c0_12 = arith.constant 0 : index
    %c0_13 = arith.constant 0 : index
    %12 = vector.load %arg6[%c0_12, %c0_13] : memref<6x1xf32, #tpu.memory_space<vmem>>, vector<6x1xf32>
    %13 = vector.broadcast %12 : vector<6x1xf32> to vector<6x256xf32>
    %14 = arith.addf %11, %13 : vector<6x256xf32>
    %cst_14 = arith.constant 0.000000e+00 : f32
    %15 = vector.broadcast %cst_14 : f32 to vector<6x256xf32>
    %16 = arith.maximumf %14, %15 : vector<6x256xf32>
    %17 = arith.truncf %16 : vector<6x256xf32> to vector<6x256xbf16>
    %c0_15 = arith.constant 0 : index
    %c0_16 = arith.constant 0 : index
    %18 = vector.load %arg7[%c0_15, %c0_16] : memref<6x256xbf16, #tpu.memory_space<vmem>>, vector<6x256xbf16>
    tpu.vector_store %arg7[%c0_15, %c0_16], %17 {strides = array<i32>} : memref<6x256xbf16, #tpu.memory_space<vmem>>, vector<6x256xbf16>,
    return
  }
  func.func @transform_0(%arg0: i32) -> (i32, i32) {
    %c0_i32 = arith.constant 0 : i32
    %c0_i32_0 = arith.constant 0 : i32
    return %c0_i32, %arg0 : i32, i32
  }
  func.func @transform_1(%arg0: i32) -> (i32, i32) {
    %c0_i32 = arith.constant 0 : i32
    %c0_i32_0 = arith.constant 0 : i32
    return %c0_i32, %arg0 : i32, i32
  }
  func.func @transform_2(%arg0: i32) -> (i32, i32) {
    %c0_i32 = arith.constant 0 : i32
    %c0_i32_0 = arith.constant 0 : i32
    return %c0_i32, %arg0 : i32, i32
  }
  func.func @transform_3(%arg0: i32) -> (i32, i32) {
    %c0_i32 = arith.constant 0 : i32
    %c0_i32_0 = arith.constant 0 : i32
    return %c0_i32, %arg0 : i32, i32
  }
  func.func @transform_4(%arg0: i32) -> (i32, i32) {
    %c0_i32 = arith.constant 0 : i32
    %c0_i32_0 = arith.constant 0 : i32
    %c0_i32_1 = arith.constant 0 : i32
    return %c0_i32, %c0_i32_0 : i32, i32
  }
  func.func @transform_5(%arg0: i32) -> (i32, i32) {
    %c0_i32 = arith.constant 0 : i32
    %c0_i32_0 = arith.constant 0 : i32
    %c0_i32_1 = arith.constant 0 : i32
    return %c0_i32, %c0_i32_0 : i32, i32
  }
  func.func @transform_6(%arg0: i32) -> (i32, i32) {
    %c0_i32 = arith.constant 0 : i32
    %c0_i32_0 = arith.constant 0 : i32
    return %c0_i32, %arg0 : i32, i32
  }
}

module attributes {stable_mosaic.version = 11 : i64} {
  func.func @_conv_relu_pool_kernel(%arg0: i32, %arg1: memref<150x50xbf16, #tpu.memory_space<vmem>>, %arg2: memref<150x50xbf16, #tpu.memory_space<vmem>>, %arg3: memref<150x50xbf16, #tpu.memory_space<vmem>>, %arg4: memref<150x50xbf16, #tpu.memory_space<vmem>>, %arg5: memref<16x150xbf16, #tpu.memory_space<vmem>>, %arg6: memref<16x1xf32, #tpu.memory_space<vmem>>, %arg7: memref<16x50xbf16, #tpu.memory_space<vmem>>) attributes {dimension_semantics = [#tpu.dimension_semantics<parallel>], iteration_bounds = array<i64: 1>, scalar_prefetch = 0 : i64, scratch_operands = 0 : i64, tpu.core_type = #tpu.core_type<tc>, window_params = [{transform_indices = @transform_0, window_bounds = array<i64: 150, 50>}, {transform_indices = @transform_1, window_bounds = array<i64: 150, 50>}, {transform_indices = @transform_2, window_bounds = array<i64: 150, 50>}, {transform_indices = @transform_3, window_bounds = array<i64: 150, 50>}, {pipeline_mode = #tpu.pipeline_mode<synchronous>, transform_indices = @transform_4, window_bounds = array<i64: 16, 150>}, {pipeline_mode = #tpu.pipeline_mode<synchronous>, transform_indices = @transform_5, window_bounds = array<i64: 16, 1>}, {transform_indices = @transform_6, window_bounds = array<i64: 16, 50>}]} {
    %c0 = arith.constant 0 : index
    %c0_0 = arith.constant 0 : index
    %0 = vector.load %arg5[%c0, %c0_0] : memref<16x150xbf16, #tpu.memory_space<vmem>>, vector<16x150xbf16>
    %c0_1 = arith.constant 0 : index
    %c0_2 = arith.constant 0 : index
    %1 = vector.load %arg1[%c0_1, %c0_2] : memref<150x50xbf16, #tpu.memory_space<vmem>>, vector<150x50xbf16>
    %cst = arith.constant dense<0.000000e+00> : vector<16x50xf32>
    %2 = tpu.matmul %0, %1, %cst {dimension_numbers = #tpu.dot_dimension_numbers<[1], [0], [0], [1], [0, 0, 1, 1], [], []>} : vector<16x150xbf16>, vector<150x50xbf16>, vector<16x50xf32> -> vector<16x50xf32>
    %c0_3 = arith.constant 0 : index
    %c0_4 = arith.constant 0 : index
    %3 = vector.load %arg2[%c0_3, %c0_4] : memref<150x50xbf16, #tpu.memory_space<vmem>>, vector<150x50xbf16>
    %cst_5 = arith.constant dense<0.000000e+00> : vector<16x50xf32>
    %4 = tpu.matmul %0, %3, %cst_5 {dimension_numbers = #tpu.dot_dimension_numbers<[1], [0], [0], [1], [0, 0, 1, 1], [], []>} : vector<16x150xbf16>, vector<150x50xbf16>, vector<16x50xf32> -> vector<16x50xf32>
    %5 = arith.maximumf %2, %4 : vector<16x50xf32>
    %c0_6 = arith.constant 0 : index
    %c0_7 = arith.constant 0 : index
    %6 = vector.load %arg3[%c0_6, %c0_7] : memref<150x50xbf16, #tpu.memory_space<vmem>>, vector<150x50xbf16>
    %cst_8 = arith.constant dense<0.000000e+00> : vector<16x50xf32>
    %7 = tpu.matmul %0, %6, %cst_8 {dimension_numbers = #tpu.dot_dimension_numbers<[1], [0], [0], [1], [0, 0, 1, 1], [], []>} : vector<16x150xbf16>, vector<150x50xbf16>, vector<16x50xf32> -> vector<16x50xf32>
    %c0_9 = arith.constant 0 : index
    %c0_10 = arith.constant 0 : index
    %8 = vector.load %arg4[%c0_9, %c0_10] : memref<150x50xbf16, #tpu.memory_space<vmem>>, vector<150x50xbf16>
    %cst_11 = arith.constant dense<0.000000e+00> : vector<16x50xf32>
    %9 = tpu.matmul %0, %8, %cst_11 {dimension_numbers = #tpu.dot_dimension_numbers<[1], [0], [0], [1], [0, 0, 1, 1], [], []>} : vector<16x150xbf16>, vector<150x50xbf16>, vector<16x50xf32> -> vector<16x50xf32>
    %10 = arith.maximumf %7, %9 : vector<16x50xf32>
    %11 = arith.maximumf %5, %10 : vector<16x50xf32>
    %c0_12 = arith.constant 0 : index
    %c0_13 = arith.constant 0 : index
    %12 = vector.load %arg6[%c0_12, %c0_13] : memref<16x1xf32, #tpu.memory_space<vmem>>, vector<16x1xf32>
    %13 = vector.broadcast %12 : vector<16x1xf32> to vector<16x50xf32>
    %14 = arith.addf %11, %13 : vector<16x50xf32>
    %cst_14 = arith.constant 0.000000e+00 : f32
    %15 = vector.broadcast %cst_14 : f32 to vector<16x50xf32>
    %16 = arith.maximumf %14, %15 : vector<16x50xf32>
    %17 = arith.truncf %16 : vector<16x50xf32> to vector<16x50xbf16>
    %c0_15 = arith.constant 0 : index
    %c0_16 = arith.constant 0 : index
    %18 = vector.load %arg7[%c0_15, %c0_16] : memref<16x50xbf16, #tpu.memory_space<vmem>>, vector<16x50xbf16>
    tpu.vector_store %arg7[%c0_15, %c0_16], %17 {strides = array<i32>} : memref<16x50xbf16, #tpu.memory_space<vmem>>, vector<16x50xbf16>,
    return
  }
  func.func @transform_0(%arg0: i32) -> (i32, i32) {
    %c0_i32 = arith.constant 0 : i32
    %c0_i32_0 = arith.constant 0 : i32
    return %c0_i32, %arg0 : i32, i32
  }
  func.func @transform_1(%arg0: i32) -> (i32, i32) {
    %c0_i32 = arith.constant 0 : i32
    %c0_i32_0 = arith.constant 0 : i32
    return %c0_i32, %arg0 : i32, i32
  }
  func.func @transform_2(%arg0: i32) -> (i32, i32) {
    %c0_i32 = arith.constant 0 : i32
    %c0_i32_0 = arith.constant 0 : i32
    return %c0_i32, %arg0 : i32, i32
  }
  func.func @transform_3(%arg0: i32) -> (i32, i32) {
    %c0_i32 = arith.constant 0 : i32
    %c0_i32_0 = arith.constant 0 : i32
    return %c0_i32, %arg0 : i32, i32
  }
  func.func @transform_4(%arg0: i32) -> (i32, i32) {
    %c0_i32 = arith.constant 0 : i32
    %c0_i32_0 = arith.constant 0 : i32
    %c0_i32_1 = arith.constant 0 : i32
    return %c0_i32, %c0_i32_0 : i32, i32
  }
  func.func @transform_5(%arg0: i32) -> (i32, i32) {
    %c0_i32 = arith.constant 0 : i32
    %c0_i32_0 = arith.constant 0 : i32
    %c0_i32_1 = arith.constant 0 : i32
    return %c0_i32, %c0_i32_0 : i32, i32
  }
  func.func @transform_6(%arg0: i32) -> (i32, i32) {
    %c0_i32 = arith.constant 0 : i32
    %c0_i32_0 = arith.constant 0 : i32
    return %c0_i32, %arg0 : i32, i32
  }
}

module attributes {stable_mosaic.version = 11 : i64} {
  func.func @_fc_head_kernel(%arg0: i32, %arg1: memref<2x400xbf16, #tpu.memory_space<vmem>>, %arg2: memref<400x120xbf16, #tpu.memory_space<vmem>>, %arg3: memref<1x120xf32, #tpu.memory_space<vmem>>, %arg4: memref<120x84xbf16, #tpu.memory_space<vmem>>, %arg5: memref<1x84xf32, #tpu.memory_space<vmem>>, %arg6: memref<84x10xbf16, #tpu.memory_space<vmem>>, %arg7: memref<1x10xf32, #tpu.memory_space<vmem>>, %arg8: memref<2x10xf32, #tpu.memory_space<vmem>>) attributes {dimension_semantics = [#tpu.dimension_semantics<parallel>], iteration_bounds = array<i64: 1>, scalar_prefetch = 0 : i64, scratch_operands = 0 : i64, tpu.core_type = #tpu.core_type<tc>, window_params = [{transform_indices = @transform_0, window_bounds = array<i64: 2, 400>}, {pipeline_mode = #tpu.pipeline_mode<synchronous>, transform_indices = @transform_1, window_bounds = array<i64: 400, 120>}, {pipeline_mode = #tpu.pipeline_mode<synchronous>, transform_indices = @transform_2, window_bounds = array<i64: 1, 120>}, {pipeline_mode = #tpu.pipeline_mode<synchronous>, transform_indices = @transform_3, window_bounds = array<i64: 120, 84>}, {pipeline_mode = #tpu.pipeline_mode<synchronous>, transform_indices = @transform_4, window_bounds = array<i64: 1, 84>}, {pipeline_mode = #tpu.pipeline_mode<synchronous>, transform_indices = @transform_5, window_bounds = array<i64: 84, 10>}, {pipeline_mode = #tpu.pipeline_mode<synchronous>, transform_indices = @transform_6, window_bounds = array<i64: 1, 10>}, {transform_indices = @transform_7, window_bounds = array<i64: 2, 10>}]} {
    %c0 = arith.constant 0 : index
    %c0_0 = arith.constant 0 : index
    %0 = vector.load %arg1[%c0, %c0_0] : memref<2x400xbf16, #tpu.memory_space<vmem>>, vector<2x400xbf16>
    %c0_1 = arith.constant 0 : index
    %c0_2 = arith.constant 0 : index
    %1 = vector.load %arg2[%c0_1, %c0_2] : memref<400x120xbf16, #tpu.memory_space<vmem>>, vector<400x120xbf16>
    %cst = arith.constant dense<0.000000e+00> : vector<2x120xf32>
    %2 = tpu.matmul %0, %1, %cst {dimension_numbers = #tpu.dot_dimension_numbers<[1], [0], [0], [1], [0, 0, 1, 1], [], []>} : vector<2x400xbf16>, vector<400x120xbf16>, vector<2x120xf32> -> vector<2x120xf32>
    %c0_3 = arith.constant 0 : index
    %c0_4 = arith.constant 0 : index
    %3 = vector.load %arg3[%c0_3, %c0_4] : memref<1x120xf32, #tpu.memory_space<vmem>>, vector<1x120xf32>
    %4 = vector.broadcast %3 : vector<1x120xf32> to vector<2x120xf32>
    %5 = arith.addf %2, %4 : vector<2x120xf32>
    %cst_5 = arith.constant 0.000000e+00 : f32
    %6 = vector.broadcast %cst_5 : f32 to vector<2x120xf32>
    %7 = arith.maximumf %5, %6 : vector<2x120xf32>
    %8 = arith.truncf %7 : vector<2x120xf32> to vector<2x120xbf16>
    %c0_6 = arith.constant 0 : index
    %c0_7 = arith.constant 0 : index
    %9 = vector.load %arg4[%c0_6, %c0_7] : memref<120x84xbf16, #tpu.memory_space<vmem>>, vector<120x84xbf16>
    %cst_8 = arith.constant dense<0.000000e+00> : vector<2x84xf32>
    %10 = tpu.matmul %8, %9, %cst_8 {dimension_numbers = #tpu.dot_dimension_numbers<[1], [0], [0], [1], [0, 0, 1, 1], [], []>} : vector<2x120xbf16>, vector<120x84xbf16>, vector<2x84xf32> -> vector<2x84xf32>
    %c0_9 = arith.constant 0 : index
    %c0_10 = arith.constant 0 : index
    %11 = vector.load %arg5[%c0_9, %c0_10] : memref<1x84xf32, #tpu.memory_space<vmem>>, vector<1x84xf32>
    %12 = vector.broadcast %11 : vector<1x84xf32> to vector<2x84xf32>
    %13 = arith.addf %10, %12 : vector<2x84xf32>
    %cst_11 = arith.constant 0.000000e+00 : f32
    %14 = vector.broadcast %cst_11 : f32 to vector<2x84xf32>
    %15 = arith.maximumf %13, %14 : vector<2x84xf32>
    %16 = arith.truncf %15 : vector<2x84xf32> to vector<2x84xbf16>
    %c0_12 = arith.constant 0 : index
    %c0_13 = arith.constant 0 : index
    %17 = vector.load %arg6[%c0_12, %c0_13] : memref<84x10xbf16, #tpu.memory_space<vmem>>, vector<84x10xbf16>
    %cst_14 = arith.constant dense<0.000000e+00> : vector<2x10xf32>
    %18 = tpu.matmul %16, %17, %cst_14 {dimension_numbers = #tpu.dot_dimension_numbers<[1], [0], [0], [1], [0, 0, 1, 1], [], []>} : vector<2x84xbf16>, vector<84x10xbf16>, vector<2x10xf32> -> vector<2x10xf32>
    %c0_15 = arith.constant 0 : index
    %c0_16 = arith.constant 0 : index
    %19 = vector.load %arg7[%c0_15, %c0_16] : memref<1x10xf32, #tpu.memory_space<vmem>>, vector<1x10xf32>
    %20 = vector.broadcast %19 : vector<1x10xf32> to vector<2x10xf32>
    %21 = arith.addf %18, %20 : vector<2x10xf32>
    %cst_17 = arith.constant dense<0xFF800000> : vector<2xf32>
    %22 = vector.multi_reduction <maximumf>, %21, %cst_17 [1] : vector<2x10xf32> to vector<2xf32>
    %23 = vector.shape_cast %22 : vector<2xf32> to vector<2x1xf32>
    %24 = vector.broadcast %23 : vector<2x1xf32> to vector<2x10xf32>
    %25 = arith.subf %21, %24 : vector<2x10xf32>
    %26 = math.exp %25 : vector<2x10xf32>
    %cst_18 = arith.constant dense<0.000000e+00> : vector<2xf32>
    %27 = vector.multi_reduction <add>, %26, %cst_18 [1] : vector<2x10xf32> to vector<2xf32>
    %28 = vector.shape_cast %27 : vector<2xf32> to vector<2x1xf32>
    %29 = tpu.reciprocal %28 {approx = true} : vector<2x1xf32> -> vector<2x1xf32>
    %30 = vector.broadcast %29 : vector<2x1xf32> to vector<2x10xf32>
    %31 = arith.mulf %26, %30 : vector<2x10xf32>
    %c0_19 = arith.constant 0 : index
    %c0_20 = arith.constant 0 : index
    %32 = vector.load %arg8[%c0_19, %c0_20] : memref<2x10xf32, #tpu.memory_space<vmem>>, vector<2x10xf32>
    tpu.vector_store %arg8[%c0_19, %c0_20], %31 {strides = array<i32>} : memref<2x10xf32, #tpu.memory_space<vmem>>, vector<2x10xf32>,
    return
  }
  func.func @transform_0(%arg0: i32) -> (i32, i32) {
    %c0_i32 = arith.constant 0 : i32
    %c0_i32_0 = arith.constant 0 : i32
    return %arg0, %c0_i32 : i32, i32
  }
  func.func @transform_1(%arg0: i32) -> (i32, i32) {
    %c0_i32 = arith.constant 0 : i32
    %c0_i32_0 = arith.constant 0 : i32
    %c0_i32_1 = arith.constant 0 : i32
    return %c0_i32, %c0_i32_0 : i32, i32
  }
  func.func @transform_2(%arg0: i32) -> (i32, i32) {
    %c0_i32 = arith.constant 0 : i32
    %c0_i32_0 = arith.constant 0 : i32
    %c0_i32_1 = arith.constant 0 : i32
    return %c0_i32, %c0_i32_0 : i32, i32
  }
  func.func @transform_3(%arg0: i32) -> (i32, i32) {
    %c0_i32 = arith.constant 0 : i32
    %c0_i32_0 = arith.constant 0 : i32
    %c0_i32_1 = arith.constant 0 : i32
    return %c0_i32, %c0_i32_0 : i32, i32
  }
  func.func @transform_4(%arg0: i32) -> (i32, i32) {
    %c0_i32 = arith.constant 0 : i32
    %c0_i32_0 = arith.constant 0 : i32
    %c0_i32_1 = arith.constant 0 : i32
    return %c0_i32, %c0_i32_0 : i32, i32
  }
  func.func @transform_5(%arg0: i32) -> (i32, i32) {
    %c0_i32 = arith.constant 0 : i32
    %c0_i32_0 = arith.constant 0 : i32
    %c0_i32_1 = arith.constant 0 : i32
    return %c0_i32, %c0_i32_0 : i32, i32
  }
  func.func @transform_6(%arg0: i32) -> (i32, i32) {
    %c0_i32 = arith.constant 0 : i32
    %c0_i32_0 = arith.constant 0 : i32
    %c0_i32_1 = arith.constant 0 : i32
    return %c0_i32, %c0_i32_0 : i32, i32
  }
  func.func @transform_7(%arg0: i32) -> (i32, i32) {
    %c0_i32 = arith.constant 0 : i32
    %c0_i32_0 = arith.constant 0 : i32
    return %arg0, %c0_i32 : i32, i32
  }
}

</mosaic_0001>

<bundles_post_ra>
// kernel: convnet_forward.3
= control target key start
LH: loop header
LB: loop body
LE: loop exit
PB: predicated region body
PF: predicated region fallthrough
CT: control target
= control target key end

     0   :  { %s1392_s21 = smov 0   ;;  %s1394_s22 = smov 0   ;;  %s1550_s0 = inlined_call_operand.vmem [shape: bf16[75,392], index: 0, kind: input, shape index: {}]   ;;  %s1551_s1 = inlined_call_operand.vmem [shape: bf16[75,392], index: 1, kind: input, shape index: {}]   ;;  %s1552_s2 = inlined_call_operand.vmem [shape: bf16[75,392], index: 2, kind: input, shape index: {}]   ;;  %s1553_s3 = inlined_call_operand.vmem [shape: bf16[75,392], index: 3, kind: input, shape index: {}]   ;;  %s1554_s4 = inlined_call_operand.vmem [shape: bf16[6,75], index: 4, kind: input, shape index: {}]   ;;  %s1555_s5 = inlined_call_operand.vmem [shape: f32[6,1], index: 5, kind: input, shape index: {}]   ;;  %s1556_s6 = inlined_call_operand.vmem [shape: bf16[6,392], index: 6, kind: output, shape index: {}]  }
   0x1   :  { %s1396_s23 = smov 0  }
   0x2 LB: > { %s1172_s24 = sadd.s32 4294967295, %s1353_s23   ;;  %s1409_s25 = sadd.s32 1, %s1353_s23   ;;  %s1353_s23 = sphi %s1396_s23, %s1560_s23   ;;  %s1349_s22 = sphi %s1394_s22, %s1559_s22   ;;  %s1345_s21 = sphi %s1392_s21, %s1558_s21  }
   0x3   : > { %s20_s26 = ssub.s32 %s1353_s23, %s1409_s25  ;;  %s23_s27 = sadd.s32 1, %s1349_s22 }
   0x4   : > { %p21_p0 = scmp.eq.s32.totalorder %s20_s26, 0  ;;  %p30_p1 = scmp.ne.s32.totalorder %s1349_s22, %s1345_s21 }
   0x5   : > { %p31_p2 = scmp.eq.s32.totalorder %s1353_s23, 0  ;;  %p1175_p4 = scmp.ge.s32.totalorder %s1353_s23, 2 }
   0x6   : > { %s1418_s28 = scalar_select %p21_p0, %s1349_s22, %s23_s27  }
   0x7   : > { %p1420_p3 = por %p31_p2, %p30_p1  ;;  %208 = sbr.rel (%p1175_p4) target bundleno = 50 (0x32), region = 24 }
   0xe   : > { %211 = sbr.rel (!%p1420_p3) target bundleno = 23 (0x17), region = 28  ;;  %s213_s30 = sand.u32 (%p1420_p3), 1, %s1349_s22  }
   0xf   : > { %s1234_s7 = sshll.u32 (%p1420_p3), %s1353_s23, 3  ;;  %s1239_s8 = smul.u32 (%p1420_p3), 80, %s213_s30 }
  0x10   : > { %s218_s11 = scalar_lea.vmem (%p1420_p3), %s1550_s0, %s1234_s7 }
  0x11   : > { %v264_v0 = vld [vmem:[%s218_s11] sm:$0xff] (%p1420_p3)  ;;  %v266_v1 = vld [vmem:[%s218_s11 + $0x10] sm:$0xff] (%p1420_p3)  ;;  %s215_s12 = scalar_lea.vmem (%p1420_p3), [#allocation2], %s1239_s8 }
  0x12   : > { %v268_v2 = vld [vmem:[%s218_s11 + $0x20] sm:$0xff] (%p1420_p3)  ;;  %v270_v3 = vld [vmem:[%s218_s11 + $0x30] sm:$0xff] (%p1420_p3)  ;;  %265 = vst [vmem:[%s215_s12] sm:$0xff] (%p1420_p3), %v264_v0  ;;  %267 = vst [vmem:[%s215_s12 + $0x8] sm:$0xff] (%p1420_p3), %v266_v1 }
  0x13   : > { %v272_v4 = vld [vmem:[%s218_s11 + $0x40] sm:$0xff] (%p1420_p3)  ;;  %v274_v5 = vld [vmem:[%s218_s11 + $0x50] sm:$0xff] (%p1420_p3)  ;;  %269 = vst [vmem:[%s215_s12 + $0x10] sm:$0xff] (%p1420_p3), %v268_v2  ;;  %271 = vst [vmem:[%s215_s12 + $0x18] sm:$0xff] (%p1420_p3), %v270_v3 }
  0x14   : > { %273 = vst [vmem:[%s215_s12 + $0x20] sm:$0xff] (%p1420_p3), %v272_v4  ;;  %275 = vst [vmem:[%s215_s12 + $0x28] sm:$0xff] (%p1420_p3), %v274_v5  ;;  %v276_v6 = vld [vmem:[%s218_s11 + $0x60] sm:$0xff] (%p1420_p3)  ;;  %v278_v7 = vld [vmem:[%s218_s11 + $0x70] sm:$0xff] (%p1420_p3) }
  0x15   : > { %v280_v8 = vld [vmem:[%s218_s11 + $0x80] sm:$0xff]  ;;  %277 = vst [vmem:[%s215_s12 + $0x30] sm:$0xff] %v276_v6  ;;  %279 = vst [vmem:[%s215_s12 + $0x38] sm:$0xff] %v278_v7  ;;  %v282_v9 = vld [vmem:[%s218_s11 + $0x90] sm:$0xff] }
  0x16   : > { %281 = vst [vmem:[%s215_s12 + $0x40] sm:$0xff] %v280_v8  ;;  %283 = vst [vmem:[%s215_s12 + $0x48] sm:$0xff] %v282_v9 }
  0x17 PF: > { %289 = sbr.rel (!%p1420_p3) target bundleno = 32 (0x20), region = 66  ;;  %s291_s13 = sand.u32 (%p1420_p3), 1, %s1349_s22  }
  0x18   : > { %s1235_s14 = sshll.u32 (%p1420_p3), %s1353_s23, 3  ;;  %s1240_s15 = smul.u32 (%p1420_p3), 80, %s291_s13 }
  0x19   : > { %s296_s18 = scalar_lea.vmem (%p1420_p3), %s1551_s1, %s1235_s14 }
  0x1a   : > { %v342_v10 = vld [vmem:[%s296_s18] sm:$0xff] (%p1420_p3)  ;;  %v344_v11 = vld [vmem:[%s296_s18 + $0x10] sm:$0xff] (%p1420_p3)  ;;  %s293_s19 = scalar_lea.vmem (%p1420_p3), [#allocation3], %s1240_s15 }
  0x1b   : > { %v346_v12 = vld [vmem:[%s296_s18 + $0x20] sm:$0xff] (%p1420_p3)  ;;  %v348_v13 = vld [vmem:[%s296_s18 + $0x30] sm:$0xff] (%p1420_p3)  ;;  %343 = vst [vmem:[%s293_s19] sm:$0xff] (%p1420_p3), %v342_v10  ;;  %345 = vst [vmem:[%s293_s19 + $0x8] sm:$0xff] (%p1420_p3), %v344_v11 }
  0x1c   : > { %v350_v14 = vld [vmem:[%s296_s18 + $0x40] sm:$0xff] (%p1420_p3)  ;;  %v352_v15 = vld [vmem:[%s296_s18 + $0x50] sm:$0xff] (%p1420_p3)  ;;  %347 = vst [vmem:[%s293_s19 + $0x10] sm:$0xff] (%p1420_p3), %v346_v12  ;;  %349 = vst [vmem:[%s293_s19 + $0x18] sm:$0xff] (%p1420_p3), %v348_v13 }
  0x1d   : > { %351 = vst [vmem:[%s293_s19 + $0x20] sm:$0xff] (%p1420_p3), %v350_v14  ;;  %353 = vst [vmem:[%s293_s19 + $0x28] sm:$0xff] (%p1420_p3), %v352_v15  ;;  %v354_v16 = vld [vmem:[%s296_s18 + $0x60] sm:$0xff] (%p1420_p3)  ;;  %v356_v17 = vld [vmem:[%s296_s18 + $0x70] sm:$0xff] (%p1420_p3) }
  0x1e   : > { %v358_v18 = vld [vmem:[%s296_s18 + $0x80] sm:$0xff]  ;;  %355 = vst [vmem:[%s293_s19 + $0x30] sm:$0xff] %v354_v16  ;;  %357 = vst [vmem:[%s293_s19 + $0x38] sm:$0xff] %v356_v17  ;;  %v360_v19 = vld [vmem:[%s296_s18 + $0x90] sm:$0xff] }
  0x1f   : > { %359 = vst [vmem:[%s293_s19 + $0x40] sm:$0xff] %v358_v18  ;;  %361 = vst [vmem:[%s293_s19 + $0x48] sm:$0xff] %v360_v19 }
  0x20 PF: > { %367 = sbr.rel (!%p1420_p3) target bundleno = 41 (0x29), region = 104  ;;  %s369_s20 = sand.u32 (%p1420_p3), 1, %s1349_s22  }
  0x21   : > { %s1236_s26 = sshll.u32 (%p1420_p3), %s1353_s23, 3  ;;  %s1241_s27 = smul.u32 (%p1420_p3), 80, %s369_s20 }
  0x22   : > { %s374_s8 = scalar_lea.vmem (%p1420_p3), %s1552_s2, %s1236_s26 }
  0x23   : > { %v420_v20 = vld [vmem:[%s374_s8] sm:$0xff] (%p1420_p3)  ;;  %v422_v21 = vld [vmem:[%s374_s8 + $0x10] sm:$0xff] (%p1420_p3)  ;;  %s371_s9 = scalar_lea.vmem (%p1420_p3), [#allocation4], %s1241_s27 }
  0x24   : > { %v424_v22 = vld [vmem:[%s374_s8 + $0x20] sm:$0xff] (%p1420_p3)  ;;  %v426_v23 = vld [vmem:[%s374_s8 + $0x30] sm:$0xff] (%p1420_p3)  ;;  %421 = vst [vmem:[%s371_s9] sm:$0xff] (%p1420_p3), %v420_v20  ;;  %423 = vst [vmem:[%s371_s9 + $0x8] sm:$0xff] (%p1420_p3), %v422_v21 }
  0x25   : > { %v428_v24 = vld [vmem:[%s374_s8 + $0x40] sm:$0xff] (%p1420_p3)  ;;  %v430_v25 = vld [vmem:[%s374_s8 + $0x50] sm:$0xff] (%p1420_p3)  ;;  %425 = vst [vmem:[%s371_s9 + $0x10] sm:$0xff] (%p1420_p3), %v424_v22  ;;  %427 = vst [vmem:[%s371_s9 + $0x18] sm:$0xff] (%p1420_p3), %v426_v23 }
  0x26   : > { %429 = vst [vmem:[%s371_s9 + $0x20] sm:$0xff] (%p1420_p3), %v428_v24  ;;  %431 = vst [vmem:[%s371_s9 + $0x28] sm:$0xff] (%p1420_p3), %v430_v25  ;;  %v432_v26 = vld [vmem:[%s374_s8 + $0x60] sm:$0xff] (%p1420_p3)  ;;  %v434_v27 = vld [vmem:[%s374_s8 + $0x70] sm:$0xff] (%p1420_p3) }
  0x27   : > { %v436_v28 = vld [vmem:[%s374_s8 + $0x80] sm:$0xff]  ;;  %433 = vst [vmem:[%s371_s9 + $0x30] sm:$0xff] %v432_v26  ;;  %435 = vst [vmem:[%s371_s9 + $0x38] sm:$0xff] %v434_v27  ;;  %v438_v29 = vld [vmem:[%s374_s8 + $0x90] sm:$0xff] }
  0x28   : > { %437 = vst [vmem:[%s371_s9 + $0x40] sm:$0xff] %v436_v28  ;;  %439 = vst [vmem:[%s371_s9 + $0x48] sm:$0xff] %v438_v29 }
  0x29 PF: > { %445 = sbr.rel (!%p1420_p3) target bundleno = 50 (0x32), region = 142  ;;  %s447_s10 = sand.u32 (%p1420_p3), 1, %s1349_s22  }
  0x2a   : > { %s1237_s11 = sshll.u32 (%p1420_p3), %s1353_s23, 3  ;;  %s1242_s12 = smul.u32 (%p1420_p3), 80, %s447_s10 }
  0x2b   : > { %s452_s15 = scalar_lea.vmem (%p1420_p3), %s1553_s3, %s1237_s11 }
  0x2c   : > { %v498_v30 = vld [vmem:[%s452_s15] sm:$0xff] (%p1420_p3)  ;;  %v500_v31 = vld [vmem:[%s452_s15 + $0x10] sm:$0xff] (%p1420_p3)  ;;  %s449_s16 = scalar_lea.vmem (%p1420_p3), [#allocation5], %s1242_s12 }
  0x2d   : > { %v502_v32 = vld [vmem:[%s452_s15 + $0x20] sm:$0xff] (%p1420_p3)  ;;  %v504_v33 = vld [vmem:[%s452_s15 + $0x30] sm:$0xff] (%p1420_p3)  ;;  %499 = vst [vmem:[%s449_s16] sm:$0xff] (%p1420_p3), %v498_v30  ;;  %501 = vst [vmem:[%s449_s16 + $0x8] sm:$0xff] (%p1420_p3), %v500_v31 }
  0x2e   : > { %v506_v34 = vld [vmem:[%s452_s15 + $0x40] sm:$0xff] (%p1420_p3)  ;;  %v508_v35 = vld [vmem:[%s452_s15 + $0x50] sm:$0xff] (%p1420_p3)  ;;  %503 = vst [vmem:[%s449_s16 + $0x10] sm:$0xff] (%p1420_p3), %v502_v32  ;;  %505 = vst [vmem:[%s449_s16 + $0x18] sm:$0xff] (%p1420_p3), %v504_v33 }
  0x2f   : > { %507 = vst [vmem:[%s449_s16 + $0x20] sm:$0xff] (%p1420_p3), %v506_v34  ;;  %509 = vst [vmem:[%s449_s16 + $0x28] sm:$0xff] (%p1420_p3), %v508_v35  ;;  %v510_v36 = vld [vmem:[%s452_s15 + $0x60] sm:$0xff] (%p1420_p3)  ;;  %v512_v37 = vld [vmem:[%s452_s15 + $0x70] sm:$0xff] (%p1420_p3) }
  0x30   : > { %v514_v38 = vld [vmem:[%s452_s15 + $0x80] sm:$0xff]  ;;  %511 = vst [vmem:[%s449_s16 + $0x30] sm:$0xff] %v510_v36  ;;  %513 = vst [vmem:[%s449_s16 + $0x38] sm:$0xff] %v512_v37  ;;  %v516_v39 = vld [vmem:[%s452_s15 + $0x90] sm:$0xff] }
  0x31   : > { %515 = vst [vmem:[%s449_s16 + $0x40] sm:$0xff] %v514_v38  ;;  %517 = vst [vmem:[%s449_s16 + $0x48] sm:$0xff] %v516_v39 }
  0x32 PF: > { %p1184_p5 = scmp.ge.s32.totalorder %s1353_s23, 1  ;;  %p522_p6 = scmp.lt.s32.totalorder %s1353_s23, 3 }
  0x34   : > { %p523_p7 = pnand %p1184_p5, %p522_p6 }
  0x35   : > { %s529_s29 = sand.u32 (!%p523_p7), 1, %s1345_s21   ;;  %v1355_v40 = vmov (!%p523_p7), 0   ;;  %v1037_v41 = vld [vmem:[%s1555_s5] sm:$0x3f] (!%p523_p7)  ;;  %vm665_vm0 = vcmask (!%p523_p7), 1044480   ;;  %vm666_vm1 = vcmask (!%p523_p7), 1045504  }
  0x36   : > { %526 = sbr.rel (%p523_p7) target bundleno = 324 (0x144), region = 180  ;;  %707 = vmatprep.mubr.bf16.mxu0 (!%p523_p7), %v1355_v40  ;;  %812 = vmatprep.mubr.bf16.mxu1 (!%p523_p7), %v1355_v40  ;;  %v1356_v51 = vmov (!%p523_p7), 65535   ;;  %v602_v7 = vld [vmem:[%s1554_s4] sm:$0x7] (!%p523_p7)  ;;  %vm661_vm2 = vcmask (!%p523_p7), 613376   ;;  %s1185_s8 = sshll.u32 (!%p523_p7), %s1172_s24, 1 }
  0x37   : > { %s1456_s17 = smul.u32 (!%p523_p7), 80, %s529_s29  ;;  %1270 = vset.pattern.permute.xlu0 (!%p523_p7), %v1355_v40  ;;  %v667_v52 = vsel (!%p523_p7), %vm665_vm0, 4294967295, %v1356_v51  ;;  %p596_p8 = scmp.lt.s32.totalorder (!%p523_p7), %s1185_s8, 3 }
  0x38   : > { %1040 = vperm.xlu0 (!%p523_p7), %1270, %v1037_v41   ;;  %v1484_v58 = vsel (!%p523_p7), %vm666_vm1, %v667_v52, 0 }
  0x39   : > { %s1465_s20 = scalar_lea.vmem (!%p523_p7), [#allocation2], %s1456_s17  ;;  %s1469_s21 = scalar_lea.vmem (!%p523_p7), [#allocation3], %s1456_s17 }
  0x3a   : > { %v1271_v42 = vld [vmem:[%s1465_s20 + $0x4] ss:$8 sps:$4 sm:$0xff] (!%p523_p7)   ;;  %v1275_v44 = vld [vmem:[%s1465_s20] ss:$8 sps:$4 sm:$0xff] (!%p523_p7)   ;;  %v1277_v46 = vld [vmem:[%s1465_s20 + $0x14] ss:$8 sps:$4 sm:$0xff] (!%p523_p7)  }
  0x3b   : > { %v1273_v43 = vld [vmem:[%s1469_s21 + $0x4] ss:$8 sps:$4 sm:$0xff] (!%p523_p7)   ;;  %675 = vmatprep.subr.bf16.mxu0 (!%p523_p7), %v1271_v42  ;;  %v1276_v45 = vld [vmem:[%s1469_s21] ss:$8 sps:$4 sm:$0xff] (!%p523_p7)   ;;  %v1279_v47 = vld [vmem:[%s1469_s21 + $0x14] ss:$8 sps:$4 sm:$0xff] (!%p523_p7)  }
  0x3c   : > { %780 = vmatprep.subr.bf16.mxu1 (!%p523_p7), %v1273_v43  ;;  %676 = vmatpush1.bf16.msra.mxu0 (!%p523_p7), %v1275_v44  ;;  %v1281_v48 = vld [vmem:[%s1465_s20 + $0x10] ss:$8 sps:$4 sm:$0xff] (!%p523_p7)   ;;  %v1283_v50 = vld [vmem:[%s1465_s20 + $0x24] ss:$8 sps:$4 sm:$0xff] (!%p523_p7)   ;;  %v1287_v54 = vld [vmem:[%s1465_s20 + $0x20] ss:$8 sps:$4 sm:$0xff] (!%p523_p7)  }
  0x3d   : > { %781 = vmatpush1.bf16.msra.mxu1 %v1276_v45  ;;  %677 = vmatprep.subr.bf16.mxu0 %v1277_v46  ;;  %v1282_v49 = vld [vmem:[%s1469_s21 + $0x10] ss:$8 sps:$4 sm:$0xff]   ;;  %v1285_v53 = vld [vmem:[%s1469_s21 + $0x24] ss:$8 sps:$4 sm:$0xff]   ;;  %v1288_v55 = vld [vmem:[%s1469_s21 + $0x20] ss:$8 sps:$4 sm:$0xff]  }
  0x3e   : > { %782 = vmatprep.subr.bf16.mxu1 %v1279_v47  ;;  %v1289_v56 = vld [vmem:[%s1465_s20 + $0x34] ss:$8 sps:$4 sm:$0xff]   ;;  %v1293_v59 = vld [vmem:[%s1465_s20 + $0x30] ss:$8 sps:$4 sm:$0xff]   ;;  %s1491_s26 = scalar_lea.vmem [#allocation4], %s1456_s17  ;;  %s1498_s27 = scalar_lea.vmem [#allocation5], %s1456_s17 }
  0x3f   : > { %v1291_v57 = vld [vmem:[%s1469_s21 + $0x34] ss:$8 sps:$4 sm:$0xff]   ;;  %v1294_v60 = vld [vmem:[%s1469_s21 + $0x30] ss:$8 sps:$4 sm:$0xff]   ;;  %v1303_v5 = vld [vmem:[%s1491_s26 + $0x4] ss:$8 sps:$4 sm:$0xff]  }
  0x40   : > { %678 = vmatpush1.bf16.msra.mxu0 %v1281_v48  ;;  %v1295_v61 = vld [vmem:[%s1465_s20 + $0x44] ss:$8 sps:$4 sm:$0x3f]   ;;  %v1299_v0 = vld [vmem:[%s1465_s20 + $0x40] ss:$8 sps:$4 sm:$0x3f]  }
  0x41   : > { %783 = vmatpush1.bf16.msra.mxu1 %v1282_v49  ;;  %679 = vmatprep.subr.bf16.mxu0 %v1283_v50  ;;  %v1297_v62 = vld [vmem:[%s1469_s21 + $0x44] ss:$8 sps:$4 sm:$0x3f]   ;;  %v673_v63 = vand.u32 %v1295_v61, %v1484_v58  ;;  %v1300_v1 = vld [vmem:[%s1469_s21 + $0x40] ss:$8 sps:$4 sm:$0x3f]   ;;  %v670_v3 = vand.u32 %v1299_v0, %v1484_v58 }
  0x42   : > { %784 = vmatprep.subr.bf16.mxu1 %v1285_v53  ;;  %v778_v2 = vand.u32 %v1297_v62, %v1484_v58  ;;  %v775_v4 = vand.u32 %v1300_v1, %v1484_v58  ;;  %v1306_v6 = vld [vmem:[%s1498_s27 + $0x4] ss:$8 sps:$4 sm:$0xff]   ;;  %v1301_v8 = vld [vmem:[%s1491_s26] ss:$8 sps:$4 sm:$0xff]   ;;  %v1309_v10 = vld [vmem:[%s1491_s26 + $0x14] ss:$8 sps:$4 sm:$0xff]  }
  0x43   : > { %v1304_v9 = vld [vmem:[%s1498_s27] ss:$8 sps:$4 sm:$0xff]   ;;  %v1312_v11 = vld [vmem:[%s1498_s27 + $0x14] ss:$8 sps:$4 sm:$0xff]   ;;  %v1307_v12 = vld [vmem:[%s1491_s26 + $0x10] ss:$8 sps:$4 sm:$0xff]  }
  0x44   : > { %680 = vmatpush1.bf16.msra.mxu0 %v1287_v54  ;;  %v1310_v13 = vld [vmem:[%s1498_s27 + $0x10] ss:$8 sps:$4 sm:$0xff]   ;;  %v1315_v14 = vld [vmem:[%s1491_s26 + $0x24] ss:$8 sps:$4 sm:$0xff]   ;;  %v1313_v16 = vld [vmem:[%s1491_s26 + $0x20] ss:$8 sps:$4 sm:$0xff]  }
  0x45   : > { %785 = vmatpush1.bf16.msra.mxu1 %v1288_v55  ;;  %681 = vmatprep.subr.bf16.mxu0 %v1289_v56  ;;  %v1318_v15 = vld [vmem:[%s1498_s27 + $0x24] ss:$8 sps:$4 sm:$0xff]   ;;  %v1316_v17 = vld [vmem:[%s1498_s27 + $0x20] ss:$8 sps:$4 sm:$0xff]   ;;  %v1321_v18 = vld [vmem:[%s1491_s26 + $0x34] ss:$8 sps:$4 sm:$0xff]  }
  0x46   : > { %786 = vmatprep.subr.bf16.mxu1 %v1291_v57  ;;  %v1324_v19 = vld [vmem:[%s1498_s27 + $0x34] ss:$8 sps:$4 sm:$0xff]   ;;  %v1327_v20 = vld [vmem:[%s1491_s26 + $0x44] ss:$8 sps:$4 sm:$0x3f]   ;;  %s1562_s8 = smov (!%p596_p8, %s1185_s8), 3 }
  0x47   : > { %v1330_v21 = vld [vmem:[%s1498_s27 + $0x44] ss:$8 sps:$4 sm:$0x3f]   ;;  %v1319_v22 = vld [vmem:[%s1491_s26 + $0x30] ss:$8 sps:$4 sm:$0xff]   ;;  %v885_v26 = vand.u32 %v1327_v20, %v1484_v58  ;;  %s1186_s9 = sshll.u32 %s1562_s8, 2 }
  0x48   : > { %682 = vmatpush1.bf16.msra.mxu0 %v1293_v59  ;;  %v1322_v23 = vld [vmem:[%s1498_s27 + $0x30] ss:$8 sps:$4 sm:$0xff]   ;;  %v1325_v24 = vld [vmem:[%s1491_s26 + $0x40] ss:$8 sps:$4 sm:$0x3f]   ;;  %v990_v27 = vand.u32 %v1330_v21, %v1484_v58  ;;  %s599_s10 = scalar_lea.vmem %s1556_s6, %s1186_s9 }
  0x49   : > { %787 = vmatpush1.bf16.msra.mxu1 %v1294_v60  ;;  %683 = vmatprep.subr.bf16.mxu0 %v673_v63  ;;  %v1328_v25 = vld [vmem:[%s1498_s27 + $0x40] ss:$8 sps:$4 sm:$0x3f]   ;;  %v882_v28 = vand.u32 %v1325_v24, %v1484_v58 }
  0x4a   : > { %788 = vmatprep.subr.bf16.mxu1 %v778_v2  ;;  %v987_v29 = vand.u32 %v1328_v25, %v1484_v58 }
  0x4c   : > { %684 = vmatpush1.bf16.msra.mxu0 %v670_v3 }
  0x4d   : > { %789 = vmatpush1.bf16.msra.mxu1 %v775_v4  ;;  %887 = vmatprep.subr.bf16.mxu0 %v1303_v5 }
  0x4e   : > { %992 = vmatprep.subr.bf16.mxu1 %v1306_v6 }
  0x4f   : > { %1197 = vmatmul.mubr.msk.bf16.vlgmr.msra.gmra.mrb[0].mxu0 %vm661_vm2, %v602_v7 }
  0x50   : > { %1208 = vmatmul.mubr.msk.bf16.vlgmr.msra.gmra.mrb[0].mxu1 %vm661_vm2, %v602_v7  ;;  %888 = vmatpush1.bf16.msra.mxu0 %v1301_v8 }
  0x51   : > { %993 = vmatpush1.bf16.msra.mxu1 %v1304_v9  ;;  %889 = vmatprep.subr.bf16.mxu0 %v1309_v10 }
  0x52   : > { %994 = vmatprep.subr.bf16.mxu1 %v1312_v11  ;;  %919 = vmatprep.mubr.bf16.mxu0 %v1355_v40 }
  0x53   : > { %1024 = vmatprep.mubr.bf16.mxu1 %v1355_v40 }
  0x54   : > { %890 = vmatpush1.bf16.msra.mxu0 %v1307_v12 }
  0x55   : > { %995 = vmatpush1.bf16.msra.mxu1 %v1310_v13  ;;  %891 = vmatprep.subr.bf16.mxu0 %v1315_v14 }
  0x56   : > { %996 = vmatprep.subr.bf16.mxu1 %v1318_v15 }
  0x58   : > { %892 = vmatpush1.bf16.msra.mxu0 %v1313_v16 }
  0x59   : > { %997 = vmatpush1.bf16.msra.mxu1 %v1316_v17  ;;  %893 = vmatprep.subr.bf16.mxu0 %v1321_v18 }
  0x5a   : > { %998 = vmatprep.subr.bf16.mxu1 %v1324_v19 }
  0x5c   : > { %894 = vmatpush1.bf16.msra.mxu0 %v1319_v22 }
  0x5d   : > { %999 = vmatpush1.bf16.msra.mxu1 %v1322_v23  ;;  %895 = vmatprep.subr.bf16.mxu0 %v885_v26 }
  0x5e   : > { %1000 = vmatprep.subr.bf16.mxu1 %v990_v27 }
  0x60   : > { %896 = vmatpush1.bf16.msra.mxu0 %v882_v28 }
  0x61   : > { %1001 = vmatpush1.bf16.msra.mxu1 %v987_v29 }
  0x63   : > { %1219 = vmatmul.mubr.msk.bf16.vlgmr.msra.gmra.mrb[4].mxu0 %vm661_vm2, %v602_v7 }
  0x64   : > { %1230 = vmatmul.mubr.msk.bf16.vlgmr.msra.gmra.mrb[4].mxu1 %vm661_vm2, %v602_v7 }
  0xb7   : > { %v1041_v40 = vpop.permute.xlu0 %1040 }
 0x122   : > { %v709_v30 = vpop.f32.mrb[0].mxu0 }
 0x123   : > { %v814_v31 = vpop.f32.mrb[0].mxu1  ;;  %v711_v33 = vpop.f32.mrb[1].mxu0 }
 0x124   : > { %v821_v32 = vmax.f32 %v709_v30, %v814_v31  ;;  %v816_v34 = vpop.f32.mrb[1].mxu1  ;;  %v713_v36 = vpop.f32.mrb[2].mxu0 }
 0x125   : > { %v822_v35 = vmax.f32 %v711_v33, %v816_v34  ;;  %v818_v37 = vpop.f32.mrb[2].mxu1  ;;  %v714_v38 = vpop.f32.mrb[3].mxu0 }
 0x126   : > { %v819_v39 = vpop.f32.mrb[3].mxu1 }
 0x136   : > { %v921_v41 = vpop.f32.mrb[4].mxu0 }
 0x137   : > { %v1026_v42 = vpop.f32.mrb[4].mxu1  ;;  %v923_v44 = vpop.f32.mrb[5].mxu0 }
 0x138   : > { %v1033_v43 = vmax.f32 %v921_v41, %v1026_v42  ;;  %v1028_v45 = vpop.f32.mrb[5].mxu1  ;;  %v925_v47 = vpop.f32.mrb[6].mxu0 }
 0x139   : > { %v1034_v46 = vmax.f32 %v923_v44, %v1028_v45  ;;  %v1030_v48 = vpop.f32.mrb[6].mxu1  ;;  %v926_v49 = vpop.f32.mrb[7].mxu0 }
 0x13a   : > { %v1031_v50 = vpop.f32.mrb[7].mxu1  ;;  %v1035_v51 = vmax.f32 %v821_v32, %v1033_v43 }
 0x13b   : > { %v1036_v52 = vmax.f32 %v822_v35, %v1034_v46 }
 0x13c   : > { %v1043_v53 = vadd.f32 %v1041_v40, %v1035_v51 }
 0x13d   : > { %v1044_v54 = vadd.f32 %v1041_v40, %v1036_v52 }
 0x13e   : > { %v1045_v55 = vmax.f32 %v1043_v53, 0.0 }
 0x13f   : > { %v1046_v56 = vmax.f32 %v1044_v54, 0.0 }
 0x141   : > { %v1238_v57 = vpack.c.bf16 %v1046_v56, %v1045_v55 }
 0x143   : > { %1055 = vst [vmem:[%s599_s10] sm:$0x77] %v1238_v57 }
 0x144 PF: > { %p13_p9 = scmp.ge.s32.totalorder %s1409_s25, 4   ;;  %s1558_s21 = smov %s1349_s22 }
 0x145   : > { %s1559_s22 = smov %s1418_s28  ;;  %s1560_s23 = smov %s1409_s25 }
 0x146   :  { %15 = sbr.rel (!%p13_p9) target bundleno = 2 (0x2), region = 255 }

// kernel: convnet_forward.4
= control target key start
LH: loop header
LB: loop body
LE: loop exit
PB: predicated region body
PF: predicated region fallthrough
CT: control target
= control target key end

     0   :  { %v652_v0 = vmov 0   ;;  %vm111_vm0 = vcmask 179200   ;;  %vm115_vm1 = vcmask 1042432   ;;  %vm550_vm2 = vcmask 404480   ;;  %s881_s0 = inlined_call_operand.vmem [shape: bf16[150,50], index: 0, kind: input, shape index: {}]   ;;  %s882_s1 = inlined_call_operand.vmem [shape: bf16[150,50], index: 1, kind: input, shape index: {}]   ;;  %s883_s4 = inlined_call_operand.vmem [shape: bf16[16,150], index: 4, kind: input, shape index: {}]   ;;  %s884_s2 = inlined_call_operand.vmem [shape: bf16[150,50], index: 2, kind: input, shape index: {}]   ;;  %s885_s3 = inlined_call_operand.vmem [shape: bf16[150,50], index: 3, kind: input, shape index: {}]   ;;  %s886_s5 = inlined_call_operand.vmem [shape: f32[16,1], index: 5, kind: input, shape index: {}]   ;;  %s887_s6 = inlined_call_operand.vmem [shape: bf16[16,50], index: 6, kind: output, shape index: {}]  }
   0x1   :  { %119 = vmatprep.subr.bf16.mxu0 %v652_v0  ;;  %239 = vmatprep.subr.bf16.mxu1 %v652_v0  ;;  %v609_v1 = vld [vmem:[%s881_s0] sm:$0xff]   ;;  %v611_v3 = vld [vmem:[%s881_s0 + $0x8] sm:$0xff]   ;;  %v613_v5 = vld [vmem:[%s881_s0 + $0x10] sm:$0xff]  }
   0x2   :  { %v610_v2 = vld [vmem:[%s882_s1] sm:$0xff]   ;;  %608 = vset.pattern.permute.xlu0 %v652_v0  ;;  %120 = vmatpush1.bf16.msra.mxu0 %v609_v1  ;;  %v612_v4 = vld [vmem:[%s882_s1 + $0x8] sm:$0xff]   ;;  %v614_v6 = vld [vmem:[%s882_s1 + $0x10] sm:$0xff]  }
   0x3   :  { %240 = vmatpush1.bf16.msra.mxu1 %v610_v2  ;;  %121 = vmatprep.subr.bf16.mxu0 %v652_v0  ;;  %v615_v7 = vld [vmem:[%s881_s0 + $0x18] sm:$0xff]   ;;  %v617_v9 = vld [vmem:[%s881_s0 + $0x20] sm:$0xff]   ;;  %v619_v11 = vld [vmem:[%s881_s0 + $0x28] sm:$0xff]  }
   0x4   :  { %241 = vmatprep.subr.bf16.mxu1 %v652_v0  ;;  %v616_v8 = vld [vmem:[%s882_s1 + $0x18] sm:$0xff]   ;;  %v618_v10 = vld [vmem:[%s882_s1 + $0x20] sm:$0xff]   ;;  %v620_v12 = vld [vmem:[%s882_s1 + $0x28] sm:$0xff]  }
   0x5   :  { %v629_v13 = vld [vmem:[%s883_s4 + $0x4] ss:$8 sps:$4 sm:$0xff]   ;;  %v621_v14 = vld [vmem:[%s881_s0 + $0x30] sm:$0xff]   ;;  %v623_v16 = vld [vmem:[%s881_s0 + $0x38] sm:$0xff]  }
   0x6   :  { %122 = vmatpush1.bf16.msra.mxu0 %v611_v3  ;;  %569 = vmatprep.mubr.msk.bf16.mxu0 %vm111_vm0, %v629_v13  ;;  %v622_v15 = vld [vmem:[%s882_s1 + $0x30] sm:$0xff]   ;;  %v624_v17 = vld [vmem:[%s882_s1 + $0x38] sm:$0xff]   ;;  %v627_v18 = vld [vmem:[%s881_s0 + $0x48] ss:$0 sps:$4 sm:$0x77]  }
   0x7   :  { %242 = vmatpush1.bf16.msra.mxu1 %v612_v4  ;;  %123 = vmatprep.subr.bf16.mxu0 %v652_v0  ;;  %v625_v19 = vld [vmem:[%s881_s0 + $0x40] sm:$0xff]   ;;  %v628_v20 = vld [vmem:[%s882_s1 + $0x48] ss:$0 sps:$4 sm:$0x77]   ;;  %v117_v22 = vsel %vm115_vm1, %v627_v18, 0  ;;  %v636_v31 = vld [vmem:[%s884_s2 + $0x10] sm:$0xff]  }
   0x8   :  { %243 = vmatprep.subr.bf16.mxu1 %v652_v0  ;;  %580 = vmatprep.mubr.msk.bf16.mxu1 %vm111_vm0, %v629_v13  ;;  %v626_v21 = vld [vmem:[%s882_s1 + $0x40] sm:$0xff]   ;;  %v237_v23 = vsel %vm115_vm1, %v628_v20, 0  ;;  %v634_v28 = vld [vmem:[%s884_s2 + $0x8] sm:$0xff]   ;;  %v637_v32 = vld [vmem:[%s885_s3 + $0x10] sm:$0xff]  }
   0x9   :  { %v779_v24 = vld [vmem:[%s883_s4] ss:$8 sps:$4 sm:$0xff]   ;;  %v638_v33 = vld [vmem:[%s884_s2 + $0x18] sm:$0xff]   ;;  %v644_v39 = vld [vmem:[%s884_s2 + $0x30] sm:$0xff]  }
   0xa   :  { %124 = vmatpush1.bf16.msra.mxu0 %v613_v5  ;;  %v632_v25 = vld [vmem:[%s884_s2] sm:$0xff]   ;;  %v527_v29 = vld [vmem:[%s886_s5 + $0x8] sm:$0xff]  ;;  %v639_v34 = vld [vmem:[%s885_s3 + $0x18] sm:$0xff]  }
   0xb   :  { %244 = vmatpush1.bf16.msra.mxu1 %v614_v6  ;;  %125 = vmatprep.subr.bf16.mxu0 %v652_v0  ;;  %v633_v26 = vld [vmem:[%s885_s3] sm:$0xff]   ;;  %v635_v30 = vld [vmem:[%s885_s3 + $0x8] sm:$0xff]   ;;  %v645_v40 = vld [vmem:[%s885_s3 + $0x30] sm:$0xff]  }
   0xc   :  { %245 = vmatprep.subr.bf16.mxu1 %v652_v0  ;;  %v526_v27 = vld [vmem:[%s886_s5] sm:$0xff]  ;;  %v642_v37 = vld [vmem:[%s884_s2 + $0x28] sm:$0xff]   ;;  %v646_v41 = vld [vmem:[%s884_s2 + $0x38] sm:$0xff]  }
   0xd   :  { %530 = vperm.xlu0 %608, %v526_v27   ;;  %v640_v35 = vld [vmem:[%s884_s2 + $0x20] sm:$0xff]   ;;  %v643_v38 = vld [vmem:[%s885_s3 + $0x28] sm:$0xff]   ;;  %v647_v42 = vld [vmem:[%s885_s3 + $0x38] sm:$0xff]  }
   0xe   :  { %126 = vmatpush1.bf16.msra.mxu0 %v615_v7  ;;  %v641_v36 = vld [vmem:[%s885_s3 + $0x20] sm:$0xff]   ;;  %v650_v45 = vld [vmem:[%s884_s2 + $0x48] ss:$0 sps:$4 sm:$0x77]  }
   0xf   :  { %246 = vmatpush1.bf16.msra.mxu1 %v616_v8  ;;  %127 = vmatprep.subr.bf16.mxu0 %v652_v0  ;;  %v648_v43 = vld [vmem:[%s884_s2 + $0x40] sm:$0xff]   ;;  %v651_v46 = vld [vmem:[%s885_s3 + $0x48] ss:$0 sps:$4 sm:$0x77]   ;;  %v359_v47 = vsel %vm115_vm1, %v650_v45, 0 }
  0x10   :  { %247 = vmatprep.subr.bf16.mxu1 %v652_v0  ;;  %v649_v44 = vld [vmem:[%s885_s3 + $0x40] sm:$0xff]   ;;  %v479_v48 = vsel %vm115_vm1, %v651_v46, 0 }
  0x11   :  { %535 = vperm.xlu0 %608, %v527_v29  }
  0x12   :  { %128 = vmatpush1.bf16.msra.mxu0 %v617_v9 }
  0x13   :  { %248 = vmatpush1.bf16.msra.mxu1 %v618_v10  ;;  %129 = vmatprep.subr.bf16.mxu0 %v652_v0 }
  0x14   :  { %249 = vmatprep.subr.bf16.mxu1 %v652_v0 }
  0x16   :  { %130 = vmatpush1.bf16.msra.mxu0 %v619_v11 }
  0x17   :  { %250 = vmatpush1.bf16.msra.mxu1 %v620_v12  ;;  %131 = vmatprep.subr.bf16.mxu0 %v652_v0 }
  0x18   :  { %251 = vmatprep.subr.bf16.mxu1 %v652_v0 }
  0x1a   :  { %132 = vmatpush1.bf16.msra.mxu0 %v621_v14 }
  0x1b   :  { %252 = vmatpush1.bf16.msra.mxu1 %v622_v15  ;;  %133 = vmatprep.subr.bf16.mxu0 %v652_v0 }
  0x1c   :  { %253 = vmatprep.subr.bf16.mxu1 %v652_v0 }
  0x1e   :  { %134 = vmatpush1.bf16.msra.mxu0 %v623_v16 }
  0x1f   :  { %254 = vmatpush1.bf16.msra.mxu1 %v624_v17  ;;  %135 = vmatprep.subr.bf16.mxu0 %v652_v0 }
  0x20   :  { %255 = vmatprep.subr.bf16.mxu1 %v652_v0 }
  0x22   :  { %136 = vmatpush1.bf16.msra.mxu0 %v625_v19 }
  0x23   :  { %256 = vmatpush1.bf16.msra.mxu1 %v626_v21  ;;  %137 = vmatprep.subr.bf16.mxu0 %v652_v0 }
  0x24   :  { %257 = vmatprep.subr.bf16.mxu1 %v652_v0 }
  0x26   :  { %138 = vmatpush1.bf16.msra.mxu0 %v117_v22 }
  0x27   :  { %258 = vmatpush1.bf16.msra.mxu1 %v237_v23  ;;  %361 = vmatprep.subr.bf16.mxu0 %v652_v0 }
  0x28   :  { %481 = vmatprep.subr.bf16.mxu1 %v652_v0 }
  0x29   :  { %152 = vmatmul.mubr.bf16.vlgmr.msra.gmra.mrb[0].mxu0 %v779_v24 }
  0x2a   :  { %272 = vmatmul.mubr.bf16.vlgmr.msra.gmra.mrb[0].mxu1 %v779_v24  ;;  %362 = vmatpush1.bf16.msra.mxu0 %v632_v25 }
  0x2b   :  { %482 = vmatpush1.bf16.msra.mxu1 %v633_v26  ;;  %363 = vmatprep.subr.bf16.mxu0 %v652_v0 }
  0x2c   :  { %483 = vmatprep.subr.bf16.mxu1 %v652_v0  ;;  %591 = vmatprep.mubr.msk.bf16.mxu0 %vm111_vm0, %v629_v13 }
  0x2d   :  { %602 = vmatprep.mubr.msk.bf16.mxu1 %vm111_vm0, %v629_v13 }
  0x2e   :  { %364 = vmatpush1.bf16.msra.mxu0 %v634_v28 }
  0x2f   :  { %484 = vmatpush1.bf16.msra.mxu1 %v635_v30  ;;  %365 = vmatprep.subr.bf16.mxu0 %v652_v0 }
  0x30   :  { %485 = vmatprep.subr.bf16.mxu1 %v652_v0 }
  0x32   :  { %366 = vmatpush1.bf16.msra.mxu0 %v636_v31 }
  0x33   :  { %486 = vmatpush1.bf16.msra.mxu1 %v637_v32  ;;  %367 = vmatprep.subr.bf16.mxu0 %v652_v0 }
  0x34   :  { %487 = vmatprep.subr.bf16.mxu1 %v652_v0 }
  0x36   :  { %368 = vmatpush1.bf16.msra.mxu0 %v638_v33 }
  0x37   :  { %488 = vmatpush1.bf16.msra.mxu1 %v639_v34  ;;  %369 = vmatprep.subr.bf16.mxu0 %v652_v0 }
  0x38   :  { %489 = vmatprep.subr.bf16.mxu1 %v652_v0 }
  0x3a   :  { %370 = vmatpush1.bf16.msra.mxu0 %v640_v35 }
  0x3b   :  { %490 = vmatpush1.bf16.msra.mxu1 %v641_v36  ;;  %371 = vmatprep.subr.bf16.mxu0 %v652_v0 }
  0x3c   :  { %491 = vmatprep.subr.bf16.mxu1 %v652_v0 }
  0x3e   :  { %372 = vmatpush1.bf16.msra.mxu0 %v642_v37 }
  0x3f   :  { %492 = vmatpush1.bf16.msra.mxu1 %v643_v38  ;;  %373 = vmatprep.subr.bf16.mxu0 %v652_v0 }
  0x40   :  { %493 = vmatprep.subr.bf16.mxu1 %v652_v0 }
  0x42   :  { %374 = vmatpush1.bf16.msra.mxu0 %v644_v39 }
  0x43   :  { %494 = vmatpush1.bf16.msra.mxu1 %v645_v40  ;;  %375 = vmatprep.subr.bf16.mxu0 %v652_v0 }
  0x44   :  { %495 = vmatprep.subr.bf16.mxu1 %v652_v0 }
  0x46   :  { %376 = vmatpush1.bf16.msra.mxu0 %v646_v41 }
  0x47   :  { %496 = vmatpush1.bf16.msra.mxu1 %v647_v42  ;;  %377 = vmatprep.subr.bf16.mxu0 %v652_v0 }
  0x48   :  { %497 = vmatprep.subr.bf16.mxu1 %v652_v0 }
  0x4a   :  { %378 = vmatpush1.bf16.msra.mxu0 %v648_v43 }
  0x4b   :  { %498 = vmatpush1.bf16.msra.mxu1 %v649_v44  ;;  %379 = vmatprep.subr.bf16.mxu0 %v652_v0 }
  0x4c   :  { %499 = vmatprep.subr.bf16.mxu1 %v652_v0 }
  0x4e   :  { %380 = vmatpush1.bf16.msra.mxu0 %v359_v47 }
  0x4f   :  { %500 = vmatpush1.bf16.msra.mxu1 %v479_v48 }
  0x51   :  { %394 = vmatmul.mubr.bf16.vlgmr.msra.gmra.mrb[4].mxu0 %v779_v24 }
  0x52   :  { %514 = vmatmul.mubr.bf16.vlgmr.msra.gmra.mrb[4].mxu1 %v779_v24 }
  0x8c   :  { %v531_v59 = vpop.permute.xlu0 %530 }
  0x90   :  { %v536_v9 = vpop.permute.xlu0 %535 }
  0xfc   :  { %v153_v49 = vpop.f32.mrb[0].mxu0 }
  0xfd   :  { %v273_v50 = vpop.f32.mrb[0].mxu1  ;;  %v155_v51 = vpop.f32.mrb[1].mxu0 }
  0xfe   :  { %v280_v52 = vmax.f32 %v153_v49, %v273_v50  ;;  %v275_v53 = vpop.f32.mrb[1].mxu1  ;;  %v156_v54 = vpop.f32.mrb[2].mxu0 }
  0xff   :  { %v276_v55 = vpop.f32.mrb[2].mxu1  ;;  %v158_v56 = vpop.f32.mrb[3].mxu0 }
 0x100   :  { %v281_v57 = vmax.f32 %v156_v54, %v276_v55  ;;  %v278_v58 = vpop.f32.mrb[3].mxu1 }
 0x124   :  { %v395_v60 = vpop.f32.mrb[4].mxu0 }
 0x125   :  { %v515_v61 = vpop.f32.mrb[4].mxu1  ;;  %v397_v62 = vpop.f32.mrb[5].mxu0 }
 0x126   :  { %v522_v63 = vmax.f32 %v395_v60, %v515_v61  ;;  %v517_v0 = vpop.f32.mrb[5].mxu1  ;;  %v398_v1 = vpop.f32.mrb[6].mxu0 }
 0x127   :  { %v518_v2 = vpop.f32.mrb[6].mxu1  ;;  %v400_v3 = vpop.f32.mrb[7].mxu0 }
 0x128   :  { %v524_v4 = vmax.f32 %v280_v52, %v522_v63  ;;  %v523_v5 = vmax.f32 %v398_v1, %v518_v2  ;;  %v520_v6 = vpop.f32.mrb[7].mxu1 }
 0x12a   :  { %v538_v7 = vadd.f32 %v531_v59, %v524_v4  ;;  %v525_v8 = vmax.f32 %v281_v57, %v523_v5 }
 0x12c   :  { %v540_v10 = vmax.f32 %v538_v7, 0.0  ;;  %v539_v11 = vadd.f32 %v536_v9, %v525_v8 }
 0x12e   :  { %v605_v12 = vpack.c.bf16 %v540_v10, %v540_v10  ;;  %v541_v13 = vmax.f32 %v539_v11, 0.0 }
 0x130   :  { %551 = vst.msk [vmem:[%s887_s6] sm:$0xf] %vm550_vm2, %v605_v12  ;;  %v606_v14 = vpack.c.bf16 %v541_v13, %v541_v13 }
 0x132   :  { %552 = vst.msk [vmem:[%s887_s6 + $0x4] sm:$0xf] %vm550_vm2, %v606_v14 }

// kernel: convnet_forward.5
= control target key start
LH: loop header
LB: loop body
LE: loop exit
PB: predicated region body
PF: predicated region fallthrough
CT: control target
= control target key end

     0   :  { %v785_v1 = vmov 0   ;;  %v98_v20 = vlaneseq  ;;  %v786_v25 = vmov 1966171168   ;;  %vm264_vm0 = vcmask 130048   ;;  %s999_s0 = inlined_call_operand.vmem [shape: bf16[2,400], index: 0, kind: input, shape index: {}]   ;;  %s1000_s1 = inlined_call_operand.vmem [shape: bf16[400,120], index: 1, kind: input, shape index: {}]   ;;  %s1001_s2 = inlined_call_operand.vmem [shape: f32[1,120], index: 2, kind: input, shape index: {}]   ;;  %s1002_s3 = inlined_call_operand.vmem [shape: bf16[120,84], index: 3, kind: input, shape index: {}]   ;;  %s1003_s4 = inlined_call_operand.vmem [shape: f32[1,84], index: 4, kind: input, shape index: {}]   ;;  %s1004_s5 = inlined_call_operand.vmem [shape: bf16[84,10], index: 5, kind: input, shape index: {}]   ;;  %s1005_s6 = inlined_call_operand.vmem [shape: f32[1,10], index: 6, kind: input, shape index: {}]   ;;  %s1006_s7 = inlined_call_operand.hbm [shape: f32[2,10], index: 7, kind: output, shape index: {}]  }
   0x1   :  { %v718_v0 = vld [vmem:[%s1000_s1 + $0x40] sm:$0xff]   ;;  %308 = vmatprep.subr.bf16.mxu1 %v785_v1  ;;  %v721_v4 = vld [vmem:[%s1000_s1 + $0x48] sm:$0xff]   ;;  %v724_v7 = vld [vmem:[%s1000_s1 + $0x50] sm:$0xff]   ;;  %v96_v26 = vunpack.c.l.s4 %v786_v25  ;;  %v787_v38 = vmov 0.0  }
   0x2   :  { %v719_v2 = vld [vmem:[%s1000_s1 + $0x80] sm:$0xff]   ;;  %639 = vmatprep.subr.bf16.mxu0 %v718_v0  ;;  %v722_v5 = vld [vmem:[%s1000_s1 + $0x88] sm:$0xff]   ;;  %v725_v8 = vld [vmem:[%s1000_s1 + $0x90] sm:$0xff]   ;;  %v99_v27 = vshrl.u32 %v98_v20, 7 }
   0x3   :  { %v720_v3 = vld [vmem:[%s1000_s1] sm:$0xff]   ;;  %309 = vmatpush1.bf16.msra.mxu1 %v719_v2  ;;  %v723_v6 = vld [vmem:[%s1000_s1 + $0x8] sm:$0xff]   ;;  %v726_v9 = vld [vmem:[%s1000_s1 + $0x10] sm:$0xff]   ;;  %v97_v30 = vunpack.c.0.s8 %v96_v26 }
   0x4   :  { %640 = vmatpush3.bf16.msra.mxu0 %v720_v3  ;;  %310 = vmatprep.subr.bf16.mxu1 %v785_v1  ;;  %v727_v10 = vld [vmem:[%s1000_s1 + $0x58] sm:$0xff]   ;;  %v730_v13 = vld [vmem:[%s1000_s1 + $0x60] sm:$0xff]   ;;  %v733_v16 = vld [vmem:[%s1000_s1 + $0x68] sm:$0xff]  }
   0x5   :  { %641 = vmatprep.subr.bf16.mxu0 %v721_v4  ;;  %v728_v11 = vld [vmem:[%s1000_s1 + $0x98] sm:$0xff]   ;;  %v731_v14 = vld [vmem:[%s1000_s1 + $0xa0] sm:$0xff]   ;;  %v734_v17 = vld [vmem:[%s1000_s1 + $0xa8] sm:$0xff]   ;;  %v100_v32 = vsub.s32 %v97_v30, %v99_v27 }
   0x6   :  { %v729_v12 = vld [vmem:[%s1000_s1 + $0x18] sm:$0xff]   ;;  %v732_v15 = vld [vmem:[%s1000_s1 + $0x20] sm:$0xff]   ;;  %v735_v18 = vld [vmem:[%s1000_s1 + $0x28] sm:$0xff]  }
   0x7   :  { %311 = vmatpush1.bf16.msra.mxu1 %v722_v5  ;;  %v736_v19 = vld [vmem:[%s1000_s1 + $0x70] sm:$0xff]   ;;  %v594_v23 = vld.sshfl [vmem:[%s999_s0] sm:$0x33 pattern:$0x75316420]  ;;  %v739_v24 = vld [vmem:[%s1000_s1 + $0x78] sm:$0xff]  }
   0x8   :  { %642 = vmatpush3.bf16.msra.mxu0 %v723_v6  ;;  %312 = vmatprep.subr.bf16.mxu1 %v785_v1  ;;  %v737_v21 = vld [vmem:[%s1000_s1 + $0xb0] sm:$0xff]   ;;  %v740_v28 = vld [vmem:[%s1000_s1 + $0xb8] sm:$0xff]   ;;  %v94_v29 = vcombine.high %v594_v23, %v594_v23  ;;  %v742_v33 = vld [vmem:[%s1000_s1 + $0xc0] sm:$0xff]   ;;  %v101_v36 = vrot.slane %v594_v23, %v100_v32 }
   0x9   :  { %643 = vmatprep.subr.bf16.mxu0 %v724_v7  ;;  %v738_v22 = vld [vmem:[%s1000_s1 + $0x30] sm:$0xff]   ;;  %v741_v31 = vld [vmem:[%s1000_s1 + $0x38] sm:$0xff]   ;;  %v743_v34 = vld [vmem:[%s1002_s3] sm:$0xff]  }
   0xa   :  { %v108_v35 = vrot.slane %v94_v29, %v100_v32  ;;  %v109_v39 = vcombine.high %v101_v36, %v101_v36  ;;  %v744_v40 = vld [vmem:[%s1002_s3 + $0x8] sm:$0xff]  }
   0xb   :  { %313 = vmatpush1.bf16.msra.mxu1 %v725_v8 }
   0xc   :  { %644 = vmatpush3.bf16.msra.mxu0 %v726_v9  ;;  %314 = vmatprep.subr.bf16.mxu1 %v785_v1  ;;  %v110_v37 = vcombine.high %v108_v35, %v108_v35 }
   0xd   :  { %645 = vmatprep.subr.bf16.mxu0 %v727_v10  ;;  %300 = vmatprep.mubr.bf16.mxu0 %v108_v35 }
   0xe   :  { %620 = vmatprep.mubr.msk.bf16.mxu1 %vm264_vm0, %v110_v37 }
   0xf   :  { %315 = vmatpush1.bf16.msra.mxu1 %v728_v11 }
  0x10   :  { %646 = vmatpush3.bf16.msra.mxu0 %v729_v12  ;;  %316 = vmatprep.subr.bf16.mxu1 %v785_v1 }
  0x11   :  { %647 = vmatprep.subr.bf16.mxu0 %v730_v13 }
  0x13   :  { %317 = vmatpush1.bf16.msra.mxu1 %v731_v14 }
  0x14   :  { %648 = vmatpush3.bf16.msra.mxu0 %v732_v15  ;;  %318 = vmatprep.subr.bf16.mxu1 %v785_v1 }
  0x15   :  { %649 = vmatprep.subr.bf16.mxu0 %v733_v16 }
  0x17   :  { %319 = vmatpush1.bf16.msra.mxu1 %v734_v17 }
  0x18   :  { %650 = vmatpush3.bf16.msra.mxu0 %v735_v18  ;;  %320 = vmatprep.subr.bf16.mxu1 %v785_v1 }
  0x19   :  { %651 = vmatprep.subr.bf16.mxu0 %v736_v19 }
  0x1b   :  { %321 = vmatpush1.bf16.msra.mxu1 %v737_v21 }
  0x1c   :  { %652 = vmatpush3.bf16.msra.mxu0 %v738_v22  ;;  %322 = vmatprep.subr.bf16.mxu1 %v785_v1 }
  0x1d   :  { %653 = vmatprep.subr.bf16.mxu0 %v739_v24 }
  0x1f   :  { %323 = vmatpush1.bf16.msra.mxu1 %v740_v28 }
  0x20   :  { %654 = vmatpush3.bf16.msra.mxu0 %v741_v31  ;;  %324 = vmatprep.subr.bf16.mxu1 %v785_v1 }
  0x21   :  { %677 = vmatprep.subr.bf16.mxu0 %v787_v38 }
  0x23   :  { %301 = vmatmul.mubr.bf16.vlgmr.msra.gmra.mrb[0].mxu0 %v101_v36  ;;  %325 = vmatpush1.bf16.msra.mxu1 %v742_v33 }
  0x24   :  { %678 = vmatpush3.bf16.msra.mxu0 %v743_v34 }
  0x25   :  { %12 = vsyncpa [#allocation3], 0  ;;  %679 = vmatprep.subr.bf16.mxu0 %v787_v38  ;;  %697 = vmatprep.subr.bf16.mxu1 %v787_v38  ;;  %v745_v41 = vld [vmem:[%s1002_s3 + $0x10] sm:$0xff]   ;;  %v746_v42 = vld [vmem:[%s1002_s3 + $0x18] sm:$0xff]   ;;  %vm421_vm1 = vcmask 1043456   ;;  %vm788_vm2 = vmmov 0  }
  0x26   :  { %341 = vmatmul.mubr.bf16.vlgmr.msra.gmra.mrb[0].mxu1 %v109_v39  ;;  %v747_v43 = vld [vmem:[%s1002_s3 + $0x20] sm:$0xff]   ;;  %v748_v44 = vld [vmem:[%s1002_s3 + $0x28] sm:$0xff]   ;;  %v749_v45 = vld [vmem:[%s1002_s3 + $0x30] sm:$0xff]   ;;  %693 = vmatprep.mubr.msk.bf16.mxu0 %vm788_vm2, %v787_v38  ;;  %vm417_vm3 = vcmask 982016   ;;  %vm522_vm4 = vcmask 1041408   ;;  %vm518_vm5 = vcmask 687104  }
  0x27   :  { %v750_v46 = vld [vmem:[%s1002_s3 + $0x38] ss:$0 sps:$4 sm:$0xff]   ;;  %709 = vmatprep.mubr.msk.bf16.mxu1 %vm788_vm2, %v787_v38  ;;  %v751_v48 = vld [vmem:[%s1004_s5] sm:$0xff]   ;;  %v752_v49 = vld [vmem:[%s1004_s5 + $0x8] sm:$0xff]   ;;  %vm566_vm6 = vcmask 74752  }
  0x28   :  { %680 = vmatpush3.bf16.msra.mxu0 %v744_v40  ;;  %v423_v47 = vsel %vm421_vm1, %v750_v46, 0  ;;  %698 = vmatpush3.bf16.msra.mxu1 %v751_v48  ;;  %v753_v50 = vld [vmem:[%s1004_s5 + $0x10] sm:$0xff]   ;;  %v754_v51 = vld [vmem:[%s1004_s5 + $0x18] sm:$0xff]   ;;  %v593_v54 = vld [vmem:[%s1001_s2] ss:$0 sm:$0xff] }
  0x29   :  { %681 = vmatprep.subr.bf16.mxu0 %v787_v38  ;;  %699 = vmatprep.subr.bf16.mxu1 %v787_v38  ;;  %v755_v2 = vld [vmem:[%s1004_s5 + $0x20] sm:$0xff]   ;;  %v756_v3 = vld [vmem:[%s1004_s5 + $0x28] ss:$0 sps:$4 sm:$0x33]  }
  0x2a   :  { %v524_v4 = vsel %vm522_vm4, %v756_v3, 0  ;;  %v621_v5 = vld [vmem:[%s1003_s4] ss:$0 sm:$0xff]  ;;  %s789_s4 = smov [#allocation2]  }
  0x2b   :  { %v631_v13 = vld [vmem:[%s1005_s6] ss:$0 sm:$0xff]  ;;  %s585_s5 = sshll.u32 %s789_s4, 4  ;;  %s586_s5 = int_to_ptr.vmem [resolvable:$true] %s585_s5 }
  0x2c   :  { %682 = vmatpush3.bf16.msra.mxu0 %v745_v41  ;;  %700 = vmatpush3.bf16.msra.mxu1 %v752_v49  ;;  %s761_s6 = scalar_lea.vmem %s586_s5, 32  ;;  %p766_p1 = scmp.lt.s32.totalorder %s586_s5, %s586_s5 }
  0x2d   :  { %683 = vmatprep.subr.bf16.mxu0 %v787_v38  ;;  %701 = vmatprep.subr.bf16.mxu1 %v787_v38  ;;  %p762_p0 = scmp.ne.s32.totalorder %s586_s5, %s761_s6  ;;  %p767_p2 = scmp.lt.s32.totalorder %s761_s6, %s761_s6 }
  0x2f   :  { %p768_p3 = por %p767_p2, %p766_p1 }
  0x30   :  { %684 = vmatpush3.bf16.msra.mxu0 %v746_v42  ;;  %702 = vmatpush3.bf16.msra.mxu1 %v753_v50 }
  0x31   :  { %685 = vmatprep.subr.bf16.mxu0 %v787_v38  ;;  %703 = vmatprep.subr.bf16.mxu1 %v787_v38  ;;  %p769_p4 = pnand %p768_p3, %p762_p0 }
  0x34   :  { %686 = vmatpush3.bf16.msra.mxu0 %v747_v43  ;;  %704 = vmatpush3.bf16.msra.mxu1 %v754_v51 }
  0x35   :  { %687 = vmatprep.subr.bf16.mxu0 %v787_v38  ;;  %705 = vmatprep.subr.bf16.mxu1 %v787_v38 }
  0x38   :  { %688 = vmatpush3.bf16.msra.mxu0 %v748_v44  ;;  %706 = vmatpush3.bf16.msra.mxu1 %v755_v2 }
  0x39   :  { %689 = vmatprep.subr.bf16.mxu0 %v787_v38  ;;  %707 = vmatprep.subr.bf16.mxu1 %v787_v38 }
  0x3c   :  { %690 = vmatpush3.bf16.msra.mxu0 %v749_v45  ;;  %708 = vmatpush3.bf16.msra.mxu1 %v524_v4 }
  0x3d   :  { %691 = vmatprep.subr.bf16.mxu0 %v787_v38 }
  0x40   :  { %692 = vmatpush3.bf16.msra.mxu0 %v423_v47 }
  0xf6   :  { %v655_v52 = vpop.f32.mrb[0].mxu0 }
  0xf7   :  { %v656_v53 = vpop.f32.mrb[1].mxu0 }
  0xf8   :  { %v657_v55 = vadd.f32 %v656_v53, %v655_v52  ;;  %v658_v56 = vpop.f32.mrb[2].mxu0 }
  0xf9   :  { %v659_v57 = vpop.f32.mrb[3].mxu0  ;;  %v342_v58 = vpop.f32.mrb[0].mxu1 }
  0xfa   :  { %v303_v59 = vadd.f32 %v657_v55, %v593_v54  ;;  %v344_v60 = vpop.f32.mrb[1].mxu1 }
  0xfb   :  { %v345_v61 = vpop.f32.mrb[2].mxu1 }
  0xfc   :  { %v343_v62 = vadd.f32 %v342_v58, %v303_v59  ;;  %v346_v63 = vpop.f32.mrb[3].mxu1 }
  0xfe   :  { %v348_v0 = vmax.f32 %v343_v62, 0.0 }
 0x100   :  { %v349_v1 = vpack.c.bf16 %v348_v0, %v348_v0 }
 0x102   :  { %694 = vmatmul.mubr.msk.bf16.vlgmr.msra.gmra.mrb[4].mxu0 %vm417_vm3, %v349_v1 }
 0x1d5   :  { %v459_v6 = vpop.f32.mrb[4].mxu0 }
 0x1d6   :  { %v460_v7 = vadd.f32 %v621_v5, %v459_v6  ;;  %v695_v8 = vpop.f32.mrb[5].mxu0 }
 0x1d7   :  { %v462_v9 = vpop.f32.mrb[6].mxu0 }
 0x1d8   :  { %v465_v10 = vmax.f32 %v460_v7, 0.0  ;;  %v696_v11 = vpop.f32.mrb[7].mxu0 }
 0x1da   :  { %v466_v12 = vpack.c.bf16 %v465_v10, %v465_v10 }
 0x1dc   :  { %710 = vmatmul.mubr.msk.bf16.vlgmr.msra.gmra.mrb[4].mxu1 %vm518_vm5, %v466_v12 }
 0x2af   :  { %v560_v14 = vpop.f32.mrb[4].mxu1 }
 0x2b0   :  { %v561_v15 = vadd.f32 %v631_v13, %v560_v14  ;;  %v711_v16 = vpop.f32.mrb[5].mxu1 }
 0x2b1   :  { %v563_v17 = vpop.f32.mrb[6].mxu1 }
 0x2b2   :  { %v712_v18 = vpop.f32.mrb[7].mxu1  ;;  %v567_v19 = vsel %vm566_vm6, %v561_v15, -inf }
 0x2b3   :  { %568 = vmax.xlane.f32.xlu0 %v567_v19 }
 0x340   :  { %v569_v20 = vpop.xlane.xlu0 %568 }
 0x341   :  { %v570_v21 = vsub.f32 %v561_v15, %v569_v20 }
 0x343   :  { %v571_v22 = vmul.f32 1.442695, %v570_v21 }
 0x345   :  { %757 = vpow2.f32 %v571_v22 }
 0x34f   :  { %v758_v23 = vpop.eup %757 }
 0x350   :  { %v573_v24 = vsel %vm566_vm6, %v758_v23, 0.0 }
 0x351   :  { %574 = vadd.xlane.f32.xlu0 %v573_v24 }
 0x3de   :  { %v575_v25 = vpop.xlane.xlu0 %574 }
 0x3df   :  { %759 = vrcp.f32 %v575_v25 }
 0x3e9   :  { %v760_v26 = vpop.eup %759 }
 0x3ea   :  { %v577_v27 = vmul.f32 %v760_v26, %v758_v23 }
 0x3ec   :  { %578 = vst.msk [vmem:[#allocation2] sm:$0x3] %vm566_vm6, %v577_v27 }
 0x3ed   :  { %772 = shalt.err (!%p769_p4)
}
 0x3ee   :  { %s773_s14 = scalar_lea.hbm %s1006_s7, 32 }
 0x3ef   :  { %p774_p5 = scmp.ne.s32.totalorder %s1006_s7, %s773_s14  ;;  %p777_p6 = scmp.lt.u32.totalorder %s773_s14, %s1006_s7 }
 0x3f1   :  { %p779_p7 = pnand %p777_p6, %p774_p5 }
 0x3f3   :  { %782 = shalt.err (!%p779_p7)
}
 0x3f4   :  { %588 = dma.vmem_to_hbm [thread:$0]  %s586_s5, 32, %s1006_s7, [#allocation3]  }
 0x3f5   :  { %783 = dma.done.wait [#allocation3], 32  }
 0x3f6   :  { %784 = vsyncadd [#allocation3], 4294967264 }
 0x3f7   :  { %592 = vsyncpa [#allocation3], 1 }

</bundles_post_ra>
